<compile_context>
chip_gen: v5e
topology: v5e:2x2
jax: 0.10.0
libtpu: 0.0.40
codegen_flags: <defaults>
</compile_context>

<pallas_src>
import functools

import jax
import jax.numpy as jnp
from jax.experimental import pallas as pl
from jax.experimental.pallas import tpu as pltpu

BN_EPS = 1e-5


def _double_block_kernel(
    mask_ref,            # (1, L)        f32   1.0 on real output columns, 0.0 on junk
    x_ref,               # (N, Cin, P2)  bf16  zero-padded, spatially flattened input
    w1_ref,              # (9, Cmid, Cin)  bf16  conv1 taps
    g1_ref, b1_ref,      # (Cmid, 1)     f32
    w2_ref,              # (9, Cout, Cmid) bf16  conv2 taps
    g2_ref, b2_ref,      # (Cout, 1)     f32
    out_ref,             # (N, Cout, L)  f32
    y1p_ref,             # (Cmid, P2)    bf16 scratch: zero-padded stage-1 activation
    *, H, W, N, inv_count,
):
    Wp = W + 2
    L = H * Wp                                   # flattened output columns (incl. junk)
    mask = mask_ref[...]                         # (1, L)

    def conv3x3(slab, w9_ref):
        """3x3 'same' conv in transposed (C, spatial) layout.

        `slab` is a zero-padded (C, P2) bf16 slab.  Output column q = h*Wp + w
        holds the result for pixel (h, w); columns with w >= W are junk and are
        masked downstream.  Tap (dh, dw) is the lane-shifted slice
        slab[:, dh*Wp+dw : dh*Wp+dw+L]; the 9 taps are 9 accumulated bf16 MXU
        dots with an f32 accumulator (lane shifts go to the idle XLU).
        """
        c_out = w9_ref.shape[1]
        acc = jnp.zeros((c_out, L), jnp.float32)
        for dh in range(3):
            for dw in range(3):
                start = dh * Wp + dw
                tap = jax.lax.slice(slab, (0, start), (slab.shape[0], start + L))
                acc = acc + jnp.dot(w9_ref[3 * dh + dw], tap,
                                    preferred_element_type=jnp.float32)
        return acc

    def bn_scale_shift(s, q, g_ref, b_ref):
        mean = s * inv_count
        var = q * inv_count - mean * mean        # biased variance (training mode)
        inv = jax.lax.rsqrt(var + BN_EPS)
        scale = g_ref[...] * inv
        shift = b_ref[...] - mean * scale
        return scale, shift

    c_mid = g1_ref.shape[0]
    c_out = g2_ref.shape[0]

    # ---- stage 1: conv1 on every image; cache pre-BN result; BN1 batch stats
    z1 = []
    s1 = jnp.zeros((c_mid, 1), jnp.float32)
    q1 = jnp.zeros((c_mid, 1), jnp.float32)
    for n in range(N):
        z = conv3x3(x_ref[n], w1_ref)            # (Cmid, L) f32
        zm = z * mask
        s1 = s1 + jnp.sum(zm, axis=1, keepdims=True)
        q1 = q1 + jnp.sum(zm * z, axis=1, keepdims=True)
        z1.append(z)
    scale1, shift1 = bn_scale_shift(s1, q1, g1_ref, b1_ref)

    # ---- stage 2: BN1+ReLU -> conv2; cache pre-BN result; BN2 batch stats ---
    # Zero the padded slab exactly once; the interior is fully overwritten for
    # every image and the border/pad columns never change afterwards.
    y1p_ref[...] = jnp.zeros_like(y1p_ref)
    z2 = []
    s2 = jnp.zeros((c_out, 1), jnp.float32)
    q2 = jnp.zeros((c_out, 1), jnp.float32)
    for n in range(N):
        y1 = jnp.maximum(z1[n] * scale1 + shift1, 0.0) * mask
        y1p_ref[:, pl.ds(Wp + 1, L)] = y1.astype(y1p_ref.dtype)   # interior columns
        z = conv3x3(y1p_ref[...], w2_ref)        # (Cout, L) f32
        zm = z * mask
        s2 = s2 + jnp.sum(zm, axis=1, keepdims=True)
        q2 = q2 + jnp.sum(zm * z, axis=1, keepdims=True)
        z2.append(z)
    scale2, shift2 = bn_scale_shift(s2, q2, g2_ref, b2_ref)

    # ---- stage 3: BN2+ReLU -> single lane-dense write (wrapper drops junk) --
    for n in range(N):
        out_ref[n] = jnp.maximum(z2[n] * scale2 + shift2, 0.0).astype(out_ref.dtype)


@jax.jit
def double_block_forward(x_nchw, params):
    """Full DoubleBlock forward.  Input/output in PyTorch NCHW layout."""
    N, Cin, H, W = x_nchw.shape
    Cmid = params["w1"].shape[-1]
    Cout = params["w2"].shape[-1]
    Wp = W + 2
    L = H * Wp                         # flattened conv-output columns (incl. junk)
    P2 = (H + 2) * Wp + 2              # padded slab columns (+2 so every tap slice fits)

    # Zero-padded, spatially flattened, transposed (channels-on-sublanes) slab.
    xp = jnp.pad(x_nchw, ((0, 0), (0, 0), (1, 1), (1, 1)))       # (N, Cin, H+2, W+2)
    xflat = xp.reshape(N, Cin, (H + 2) * Wp)
    xflat = jnp.pad(xflat, ((0, 0), (0, 0), (0, 2))).astype(jnp.bfloat16)   # (N, Cin, P2)

    # Conv weights: HWIO -> per-tap (c_out, c_in) matrices, bf16 for the MXU.
    w1 = jnp.transpose(params["w1"], (0, 1, 3, 2)).reshape(9, Cmid, Cin).astype(jnp.bfloat16)
    w2 = jnp.transpose(params["w2"], (0, 1, 3, 2)).reshape(9, Cout, Cmid).astype(jnp.bfloat16)
    g1 = params["gamma1"].reshape(Cmid, 1).astype(jnp.float32)
    b1 = params["beta1"].reshape(Cmid, 1).astype(jnp.float32)
    g2 = params["gamma2"].reshape(Cout, 1).astype(jnp.float32)
    b2 = params["beta2"].reshape(Cout, 1).astype(jnp.float32)

    # Valid-column mask: flattened column q = h*(W+2)+w is a real pixel iff w < W.
    q = jnp.arange(L, dtype=jnp.int32)
    mask = ((q % Wp) < W).astype(jnp.float32)[None, :]           # (1, L), ~1.2 KB

    kernel = functools.partial(_double_block_kernel, H=H, W=W, N=N,
                               inv_count=1.0 / float(N * H * W))

    out_flat = pl.pallas_call(
        kernel,
        out_shape=jax.ShapeDtypeStruct((N, Cout, L), jnp.float32),
        grid_spec=pltpu.PrefetchScalarGridSpec(
            num_scalar_prefetch=0,
            grid=(1,),                                            # everything fits VMEM
            in_specs=[
                pl.BlockSpec((1, L), lambda i: (0, 0)),           # mask
                pl.BlockSpec((N, Cin, P2), lambda i: (0, 0, 0)),  # x slab
                pl.BlockSpec((9, Cmid, Cin), lambda i: (0, 0, 0)),   # w1 taps
                pl.BlockSpec((Cmid, 1), lambda i: (0, 0)),        # gamma1
                pl.BlockSpec((Cmid, 1), lambda i: (0, 0)),        # beta1
                pl.BlockSpec((9, Cout, Cmid), lambda i: (0, 0, 0)),  # w2 taps
                pl.BlockSpec((Cout, 1), lambda i: (0, 0)),        # gamma2
                pl.BlockSpec((Cout, 1), lambda i: (0, 0)),        # beta2
            ],
            out_specs=pl.BlockSpec((N, Cout, L), lambda i: (0, 0, 0)),
            scratch_shapes=[
                pltpu.VMEM((Cmid, P2), jnp.bfloat16),             # padded stage-1 act
            ],
        ),
        compiler_params=pltpu.CompilerParams(
            dimension_semantics=("arbitrary",),
            # Working set is a few hundred KiB; 32 MiB is safe on every
            # generation (v7x physical VMEM is 64 MiB).
            vmem_limit_bytes=32 * 1024 * 1024,
        ),
    )(mask, xflat, w1, g1, b1, w2, g2, b2)

    # (N, Cout, L) -> (N, Cout, H, W): column q = h*(W+2)+w, keep w < W.
    return out_flat.reshape(N, Cout, H, Wp)[:, :, :, :W]


def init_double_block_params(key, in_channels, out_channels, middle_channels=None):
    """Parameter init mirroring the PyTorch module's shapes (conv weights in
    HWIO; BN gamma/beta at their PyTorch defaults of ones/zeros)."""
    if middle_channels is None:
        middle_channels = out_channels
    k1, k2 = jax.random.split(key)
    fan1 = in_channels * 9
    fan2 = middle_channels * 9
    w1 = jax.random.normal(k1, (3, 3, in_channels, middle_channels),
                           jnp.float32) * (2.0 / fan1) ** 0.5
    w2 = jax.random.normal(k2, (3, 3, middle_channels, out_channels),
                           jnp.float32) * (2.0 / fan2) ** 0.5
    return {
        "w1": w1,
        "gamma1": jnp.ones((middle_channels,), jnp.float32),
        "beta1": jnp.zeros((middle_channels,), jnp.float32),
        "w2": w2,
        "gamma2": jnp.ones((out_channels,), jnp.float32),
        "beta2": jnp.zeros((out_channels,), jnp.float32),
    }


def _reference_forward(x_nchw, params):
    """Pure-XLA f32 reference (training-mode BatchNorm) for a sanity check."""
    def step(x, w, g, b):
        z = jax.lax.conv_general_dilated(
            x, w, window_strides=(1, 1), padding="SAME",
            dimension_numbers=("NCHW", "HWIO", "NCHW"))
        mean = jnp.mean(z, axis=(0, 2, 3), keepdims=True)
        var = jnp.mean(jnp.square(z - mean), axis=(0, 2, 3), keepdims=True)
        zn = (z - mean) * jax.lax.rsqrt(var + BN_EPS)
        return jnp.maximum(zn * g.reshape(1, -1, 1, 1) + b.reshape(1, -1, 1, 1), 0.0)

    x = step(x_nchw, params["w1"], params["gamma1"], params["beta1"])
    x = step(x, params["w2"], params["gamma2"], params["beta2"])
    return x


if __name__ == "__main__":
    key = jax.random.PRNGKey(0)
    k_x, k_p = jax.random.split(key)

    in_channels, out_channels = 4, 8
    N, H, W = 2, 16, 16

    x = jax.random.normal(k_x, (N, in_channels, H, W), jnp.float32)   # NCHW
    params = init_double_block_params(k_p, in_channels, out_channels)

    y = double_block_forward(x, params)
    jax.block_until_ready(y)

    assert y.shape == (N, out_channels, H, W), y.shape
    assert bool(jnp.all(jnp.isfinite(y)))
    assert bool(jnp.all(y >= 0.0))          # ReLU output

    # Sanity check against a pure-XLA f32 reference (loose tolerance: the kernel
    # runs the MXU fully in bf16, with f32 accumulation and BN math).
    y_ref = _reference_forward(x, params)
    max_err = float(jnp.max(jnp.abs(y - y_ref)))
    assert max_err < 1e-1, max_err

    print("KERNEL_OK")
</pallas_src>

<mosaic_0001>
module attributes {stable_mosaic.version = 11 : i64} {
  func.func @_double_block_kernel(%arg0: i32, %arg1: memref<1x288xf32, #tpu.memory_space<vmem>>, %arg2: memref<2x4x326xbf16, #tpu.memory_space<vmem>>, %arg3: memref<9x8x4xbf16, #tpu.memory_space<vmem>>, %arg4: memref<8x1xf32, #tpu.memory_space<vmem>>, %arg5: memref<8x1xf32, #tpu.memory_space<vmem>>, %arg6: memref<9x8x8xbf16, #tpu.memory_space<vmem>>, %arg7: memref<8x1xf32, #tpu.memory_space<vmem>>, %arg8: memref<8x1xf32, #tpu.memory_space<vmem>>, %arg9: memref<2x8x288xf32, #tpu.memory_space<vmem>>, %arg10: memref<8x326xbf16, #tpu.memory_space<vmem>>) attributes {dimension_semantics = [#tpu.dimension_semantics<arbitrary>], iteration_bounds = array<i64: 1>, scalar_prefetch = 0 : i64, scratch_operands = 1 : i64, tpu.core_type = #tpu.core_type<tc>, window_params = [{pipeline_mode = #tpu.pipeline_mode<synchronous>, transform_indices = @transform_0, window_bounds = array<i64: 1, 288>}, {pipeline_mode = #tpu.pipeline_mode<synchronous>, transform_indices = @transform_1, window_bounds = array<i64: 2, 4, 326>}, {pipeline_mode = #tpu.pipeline_mode<synchronous>, transform_indices = @transform_2, window_bounds = array<i64: 9, 8, 4>}, {pipeline_mode = #tpu.pipeline_mode<synchronous>, transform_indices = @transform_3, window_bounds = array<i64: 8, 1>}, {pipeline_mode = #tpu.pipeline_mode<synchronous>, transform_indices = @transform_4, window_bounds = array<i64: 8, 1>}, {pipeline_mode = #tpu.pipeline_mode<synchronous>, transform_indices = @transform_5, window_bounds = array<i64: 9, 8, 8>}, {pipeline_mode = #tpu.pipeline_mode<synchronous>, transform_indices = @transform_6, window_bounds = array<i64: 8, 1>}, {pipeline_mode = #tpu.pipeline_mode<synchronous>, transform_indices = @transform_7, window_bounds = array<i64: 8, 1>}, {pipeline_mode = #tpu.pipeline_mode<synchronous>, transform_indices = @transform_8, window_bounds = array<i64: 2, 8, 288>}]} {
    %c0 = arith.constant 0 : index
    %c0_0 = arith.constant 0 : index
    %0 = vector.load %arg1[%c0, %c0_0] : memref<1x288xf32, #tpu.memory_space<vmem>>, vector<1x288xf32>
    %cst = arith.constant 0.000000e+00 : f32
    %1 = vector.broadcast %cst : f32 to vector<8x1xf32>
    %cst_1 = arith.constant 0.000000e+00 : f32
    %2 = vector.broadcast %cst_1 : f32 to vector<8x1xf32>
    %c0_2 = arith.constant 0 : index
    %c0_3 = arith.constant 0 : index
    %c0_4 = arith.constant 0 : index
    %3 = vector.load %arg2[%c0_2, %c0_3, %c0_4] : memref<2x4x326xbf16, #tpu.memory_space<vmem>>, vector<1x4x326xbf16>
    %4 = vector.shape_cast %3 : vector<1x4x326xbf16> to vector<4x326xbf16>
    %cst_5 = arith.constant 0.000000e+00 : f32
    %5 = vector.broadcast %cst_5 : f32 to vector<8x288xf32>
    %6 = vector.extract_strided_slice %4 {offsets = [0, 0], sizes = [4, 288], strides = [1, 1]} : vector<4x326xbf16> to vector<4x288xbf16>
    %c0_6 = arith.constant 0 : index
    %c0_7 = arith.constant 0 : index
    %c0_8 = arith.constant 0 : index
    %7 = vector.load %arg3[%c0_6, %c0_7, %c0_8] : memref<9x8x4xbf16, #tpu.memory_space<vmem>>, vector<1x8x4xbf16>
    %8 = vector.shape_cast %7 : vector<1x8x4xbf16> to vector<8x4xbf16>
    %cst_9 = arith.constant dense<0.000000e+00> : vector<8x288xf32>
    %9 = tpu.matmul %8, %6, %cst_9 {dimension_numbers = #tpu.dot_dimension_numbers<[1], [0], [0], [1], [0, 0, 1, 1], [], []>} : vector<8x4xbf16>, vector<4x288xbf16>, vector<8x288xf32> -> vector<8x288xf32>
    %10 = arith.addf %5, %9 : vector<8x288xf32>
    %11 = vector.extract_strided_slice %4 {offsets = [0, 1], sizes = [4, 288], strides = [1, 1]} : vector<4x326xbf16> to vector<4x288xbf16>
    %c1 = arith.constant 1 : index
    %c0_10 = arith.constant 0 : index
    %c0_11 = arith.constant 0 : index
    %12 = vector.load %arg3[%c1, %c0_10, %c0_11] : memref<9x8x4xbf16, #tpu.memory_space<vmem>>, vector<1x8x4xbf16>
    %13 = vector.shape_cast %12 : vector<1x8x4xbf16> to vector<8x4xbf16>
    %cst_12 = arith.constant dense<0.000000e+00> : vector<8x288xf32>
    %14 = tpu.matmul %13, %11, %cst_12 {dimension_numbers = #tpu.dot_dimension_numbers<[1], [0], [0], [1], [0, 0, 1, 1], [], []>} : vector<8x4xbf16>, vector<4x288xbf16>, vector<8x288xf32> -> vector<8x288xf32>
    %15 = arith.addf %10, %14 : vector<8x288xf32>
    %16 = vector.extract_strided_slice %4 {offsets = [0, 2], sizes = [4, 288], strides = [1, 1]} : vector<4x326xbf16> to vector<4x288xbf16>
    %c2 = arith.constant 2 : index
    %c0_13 = arith.constant 0 : index
    %c0_14 = arith.constant 0 : index
    %17 = vector.load %arg3[%c2, %c0_13, %c0_14] : memref<9x8x4xbf16, #tpu.memory_space<vmem>>, vector<1x8x4xbf16>
    %18 = vector.shape_cast %17 : vector<1x8x4xbf16> to vector<8x4xbf16>
    %cst_15 = arith.constant dense<0.000000e+00> : vector<8x288xf32>
    %19 = tpu.matmul %18, %16, %cst_15 {dimension_numbers = #tpu.dot_dimension_numbers<[1], [0], [0], [1], [0, 0, 1, 1], [], []>} : vector<8x4xbf16>, vector<4x288xbf16>, vector<8x288xf32> -> vector<8x288xf32>
    %20 = arith.addf %15, %19 : vector<8x288xf32>
    %21 = vector.extract_strided_slice %4 {offsets = [0, 18], sizes = [4, 288], strides = [1, 1]} : vector<4x326xbf16> to vector<4x288xbf16>
    %c3 = arith.constant 3 : index
    %c0_16 = arith.constant 0 : index
    %c0_17 = arith.constant 0 : index
    %22 = vector.load %arg3[%c3, %c0_16, %c0_17] : memref<9x8x4xbf16, #tpu.memory_space<vmem>>, vector<1x8x4xbf16>
    %23 = vector.shape_cast %22 : vector<1x8x4xbf16> to vector<8x4xbf16>
    %cst_18 = arith.constant dense<0.000000e+00> : vector<8x288xf32>
    %24 = tpu.matmul %23, %21, %cst_18 {dimension_numbers = #tpu.dot_dimension_numbers<[1], [0], [0], [1], [0, 0, 1, 1], [], []>} : vector<8x4xbf16>, vector<4x288xbf16>, vector<8x288xf32> -> vector<8x288xf32>
    %25 = arith.addf %20, %24 : vector<8x288xf32>
    %26 = vector.extract_strided_slice %4 {offsets = [0, 19], sizes = [4, 288], strides = [1, 1]} : vector<4x326xbf16> to vector<4x288xbf16>
    %c4 = arith.constant 4 : index
    %c0_19 = arith.constant 0 : index
    %c0_20 = arith.constant 0 : index
    %27 = vector.load %arg3[%c4, %c0_19, %c0_20] : memref<9x8x4xbf16, #tpu.memory_space<vmem>>, vector<1x8x4xbf16>
    %28 = vector.shape_cast %27 : vector<1x8x4xbf16> to vector<8x4xbf16>
    %cst_21 = arith.constant dense<0.000000e+00> : vector<8x288xf32>
    %29 = tpu.matmul %28, %26, %cst_21 {dimension_numbers = #tpu.dot_dimension_numbers<[1], [0], [0], [1], [0, 0, 1, 1], [], []>} : vector<8x4xbf16>, vector<4x288xbf16>, vector<8x288xf32> -> vector<8x288xf32>
    %30 = arith.addf %25, %29 : vector<8x288xf32>
    %31 = vector.extract_strided_slice %4 {offsets = [0, 20], sizes = [4, 288], strides = [1, 1]} : vector<4x326xbf16> to vector<4x288xbf16>
    %c5 = arith.constant 5 : index
    %c0_22 = arith.constant 0 : index
    %c0_23 = arith.constant 0 : index
    %32 = vector.load %arg3[%c5, %c0_22, %c0_23] : memref<9x8x4xbf16, #tpu.memory_space<vmem>>, vector<1x8x4xbf16>
    %33 = vector.shape_cast %32 : vector<1x8x4xbf16> to vector<8x4xbf16>
    %cst_24 = arith.constant dense<0.000000e+00> : vector<8x288xf32>
    %34 = tpu.matmul %33, %31, %cst_24 {dimension_numbers = #tpu.dot_dimension_numbers<[1], [0], [0], [1], [0, 0, 1, 1], [], []>} : vector<8x4xbf16>, vector<4x288xbf16>, vector<8x288xf32> -> vector<8x288xf32>
    %35 = arith.addf %30, %34 : vector<8x288xf32>
    %36 = vector.extract_strided_slice %4 {offsets = [0, 36], sizes = [4, 288], strides = [1, 1]} : vector<4x326xbf16> to vector<4x288xbf16>
    %c6 = arith.constant 6 : index
    %c0_25 = arith.constant 0 : index
    %c0_26 = arith.constant 0 : index
    %37 = vector.load %arg3[%c6, %c0_25, %c0_26] : memref<9x8x4xbf16, #tpu.memory_space<vmem>>, vector<1x8x4xbf16>
    %38 = vector.shape_cast %37 : vector<1x8x4xbf16> to vector<8x4xbf16>
    %cst_27 = arith.constant dense<0.000000e+00> : vector<8x288xf32>
    %39 = tpu.matmul %38, %36, %cst_27 {dimension_numbers = #tpu.dot_dimension_numbers<[1], [0], [0], [1], [0, 0, 1, 1], [], []>} : vector<8x4xbf16>, vector<4x288xbf16>, vector<8x288xf32> -> vector<8x288xf32>
    %40 = arith.addf %35, %39 : vector<8x288xf32>
    %41 = vector.extract_strided_slice %4 {offsets = [0, 37], sizes = [4, 288], strides = [1, 1]} : vector<4x326xbf16> to vector<4x288xbf16>
    %c7 = arith.constant 7 : index
    %c0_28 = arith.constant 0 : index
    %c0_29 = arith.constant 0 : index
    %42 = vector.load %arg3[%c7, %c0_28, %c0_29] : memref<9x8x4xbf16, #tpu.memory_space<vmem>>, vector<1x8x4xbf16>
    %43 = vector.shape_cast %42 : vector<1x8x4xbf16> to vector<8x4xbf16>
    %cst_30 = arith.constant dense<0.000000e+00> : vector<8x288xf32>
    %44 = tpu.matmul %43, %41, %cst_30 {dimension_numbers = #tpu.dot_dimension_numbers<[1], [0], [0], [1], [0, 0, 1, 1], [], []>} : vector<8x4xbf16>, vector<4x288xbf16>, vector<8x288xf32> -> vector<8x288xf32>
    %45 = arith.addf %40, %44 : vector<8x288xf32>
    %46 = vector.extract_strided_slice %4 {offsets = [0, 38], sizes = [4, 288], strides = [1, 1]} : vector<4x326xbf16> to vector<4x288xbf16>
    %c8 = arith.constant 8 : index
    %c0_31 = arith.constant 0 : index
    %c0_32 = arith.constant 0 : index
    %47 = vector.load %arg3[%c8, %c0_31, %c0_32] : memref<9x8x4xbf16, #tpu.memory_space<vmem>>, vector<1x8x4xbf16>
    %48 = vector.shape_cast %47 : vector<1x8x4xbf16> to vector<8x4xbf16>
    %cst_33 = arith.constant dense<0.000000e+00> : vector<8x288xf32>
    %49 = tpu.matmul %48, %46, %cst_33 {dimension_numbers = #tpu.dot_dimension_numbers<[1], [0], [0], [1], [0, 0, 1, 1], [], []>} : vector<8x4xbf16>, vector<4x288xbf16>, vector<8x288xf32> -> vector<8x288xf32>
    %50 = arith.addf %45, %49 : vector<8x288xf32>
    %51 = vector.broadcast %0 : vector<1x288xf32> to vector<8x288xf32>
    %52 = arith.mulf %50, %51 : vector<8x288xf32>
    %cst_34 = arith.constant dense<0.000000e+00> : vector<8xf32>
    %53 = vector.multi_reduction <add>, %52, %cst_34 [1] : vector<8x288xf32> to vector<8xf32>
    %54 = vector.shape_cast %53 : vector<8xf32> to vector<8x1xf32>
    %55 = arith.addf %1, %54 : vector<8x1xf32>
    %56 = arith.mulf %52, %50 : vector<8x288xf32>
    %cst_35 = arith.constant dense<0.000000e+00> : vector<8xf32>
    %57 = vector.multi_reduction <add>, %56, %cst_35 [1] : vector<8x288xf32> to vector<8xf32>
    %58 = vector.shape_cast %57 : vector<8xf32> to vector<8x1xf32>
    %59 = arith.addf %2, %58 : vector<8x1xf32>
    %c1_36 = arith.constant 1 : index
    %c0_37 = arith.constant 0 : index
    %c0_38 = arith.constant 0 : index
    %60 = vector.load %arg2[%c1_36, %c0_37, %c0_38] : memref<2x4x326xbf16, #tpu.memory_space<vmem>>, vector<1x4x326xbf16>
    %61 = vector.shape_cast %60 : vector<1x4x326xbf16> to vector<4x326xbf16>
    %cst_39 = arith.constant 0.000000e+00 : f32
    %62 = vector.broadcast %cst_39 : f32 to vector<8x288xf32>
    %63 = vector.extract_strided_slice %61 {offsets = [0, 0], sizes = [4, 288], strides = [1, 1]} : vector<4x326xbf16> to vector<4x288xbf16>
    %c0_40 = arith.constant 0 : index
    %c0_41 = arith.constant 0 : index
    %c0_42 = arith.constant 0 : index
    %64 = vector.load %arg3[%c0_40, %c0_41, %c0_42] : memref<9x8x4xbf16, #tpu.memory_space<vmem>>, vector<1x8x4xbf16>
    %65 = vector.shape_cast %64 : vector<1x8x4xbf16> to vector<8x4xbf16>
    %cst_43 = arith.constant dense<0.000000e+00> : vector<8x288xf32>
    %66 = tpu.matmul %65, %63, %cst_43 {dimension_numbers = #tpu.dot_dimension_numbers<[1], [0], [0], [1], [0, 0, 1, 1], [], []>} : vector<8x4xbf16>, vector<4x288xbf16>, vector<8x288xf32> -> vector<8x288xf32>
    %67 = arith.addf %62, %66 : vector<8x288xf32>
    %68 = vector.extract_strided_slice %61 {offsets = [0, 1], sizes = [4, 288], strides = [1, 1]} : vector<4x326xbf16> to vector<4x288xbf16>
    %c1_44 = arith.constant 1 : index
    %c0_45 = arith.constant 0 : index
    %c0_46 = arith.constant 0 : index
    %69 = vector.load %arg3[%c1_44, %c0_45, %c0_46] : memref<9x8x4xbf16, #tpu.memory_space<vmem>>, vector<1x8x4xbf16>
    %70 = vector.shape_cast %69 : vector<1x8x4xbf16> to vector<8x4xbf16>
    %cst_47 = arith.constant dense<0.000000e+00> : vector<8x288xf32>
    %71 = tpu.matmul %70, %68, %cst_47 {dimension_numbers = #tpu.dot_dimension_numbers<[1], [0], [0], [1], [0, 0, 1, 1], [], []>} : vector<8x4xbf16>, vector<4x288xbf16>, vector<8x288xf32> -> vector<8x288xf32>
    %72 = arith.addf %67, %71 : vector<8x288xf32>
    %73 = vector.extract_strided_slice %61 {offsets = [0, 2], sizes = [4, 288], strides = [1, 1]} : vector<4x326xbf16> to vector<4x288xbf16>
    %c2_48 = arith.constant 2 : index
    %c0_49 = arith.constant 0 : index
    %c0_50 = arith.constant 0 : index
    %74 = vector.load %arg3[%c2_48, %c0_49, %c0_50] : memref<9x8x4xbf16, #tpu.memory_space<vmem>>, vector<1x8x4xbf16>
    %75 = vector.shape_cast %74 : vector<1x8x4xbf16> to vector<8x4xbf16>
    %cst_51 = arith.constant dense<0.000000e+00> : vector<8x288xf32>
    %76 = tpu.matmul %75, %73, %cst_51 {dimension_numbers = #tpu.dot_dimension_numbers<[1], [0], [0], [1], [0, 0, 1, 1], [], []>} : vector<8x4xbf16>, vector<4x288xbf16>, vector<8x288xf32> -> vector<8x288xf32>
    %77 = arith.addf %72, %76 : vector<8x288xf32>
    %78 = vector.extract_strided_slice %61 {offsets = [0, 18], sizes = [4, 288], strides = [1, 1]} : vector<4x326xbf16> to vector<4x288xbf16>
    %c3_52 = arith.constant 3 : index
    %c0_53 = arith.constant 0 : index
    %c0_54 = arith.constant 0 : index
    %79 = vector.load %arg3[%c3_52, %c0_53, %c0_54] : memref<9x8x4xbf16, #tpu.memory_space<vmem>>, vector<1x8x4xbf16>
    %80 = vector.shape_cast %79 : vector<1x8x4xbf16> to vector<8x4xbf16>
    %cst_55 = arith.constant dense<0.000000e+00> : vector<8x288xf32>
    %81 = tpu.matmul %80, %78, %cst_55 {dimension_numbers = #tpu.dot_dimension_numbers<[1], [0], [0], [1], [0, 0, 1, 1], [], []>} : vector<8x4xbf16>, vector<4x288xbf16>, vector<8x288xf32> -> vector<8x288xf32>
    %82 = arith.addf %77, %81 : vector<8x288xf32>
    %83 = vector.extract_strided_slice %61 {offsets = [0, 19], sizes = [4, 288], strides = [1, 1]} : vector<4x326xbf16> to vector<4x288xbf16>
    %c4_56 = arith.constant 4 : index
    %c0_57 = arith.constant 0 : index
    %c0_58 = arith.constant 0 : index
    %84 = vector.load %arg3[%c4_56, %c0_57, %c0_58] : memref<9x8x4xbf16, #tpu.memory_space<vmem>>, vector<1x8x4xbf16>
    %85 = vector.shape_cast %84 : vector<1x8x4xbf16> to vector<8x4xbf16>
    %cst_59 = arith.constant dense<0.000000e+00> : vector<8x288xf32>
    %86 = tpu.matmul %85, %83, %cst_59 {dimension_numbers = #tpu.dot_dimension_numbers<[1], [0], [0], [1], [0, 0, 1, 1], [], []>} : vector<8x4xbf16>, vector<4x288xbf16>, vector<8x288xf32> -> vector<8x288xf32>
    %87 = arith.addf %82, %86 : vector<8x288xf32>
    %88 = vector.extract_strided_slice %61 {offsets = [0, 20], sizes = [4, 288], strides = [1, 1]} : vector<4x326xbf16> to vector<4x288xbf16>
    %c5_60 = arith.constant 5 : index
    %c0_61 = arith.constant 0 : index
    %c0_62 = arith.constant 0 : index
    %89 = vector.load %arg3[%c5_60, %c0_61, %c0_62] : memref<9x8x4xbf16, #tpu.memory_space<vmem>>, vector<1x8x4xbf16>
    %90 = vector.shape_cast %89 : vector<1x8x4xbf16> to vector<8x4xbf16>
    %cst_63 = arith.constant dense<0.000000e+00> : vector<8x288xf32>
    %91 = tpu.matmul %90, %88, %cst_63 {dimension_numbers = #tpu.dot_dimension_numbers<[1], [0], [0], [1], [0, 0, 1, 1], [], []>} : vector<8x4xbf16>, vector<4x288xbf16>, vector<8x288xf32> -> vector<8x288xf32>
    %92 = arith.addf %87, %91 : vector<8x288xf32>
    %93 = vector.extract_strided_slice %61 {offsets = [0, 36], sizes = [4, 288], strides = [1, 1]} : vector<4x326xbf16> to vector<4x288xbf16>
    %c6_64 = arith.constant 6 : index
    %c0_65 = arith.constant 0 : index
    %c0_66 = arith.constant 0 : index
    %94 = vector.load %arg3[%c6_64, %c0_65, %c0_66] : memref<9x8x4xbf16, #tpu.memory_space<vmem>>, vector<1x8x4xbf16>
    %95 = vector.shape_cast %94 : vector<1x8x4xbf16> to vector<8x4xbf16>
    %cst_67 = arith.constant dense<0.000000e+00> : vector<8x288xf32>
    %96 = tpu.matmul %95, %93, %cst_67 {dimension_numbers = #tpu.dot_dimension_numbers<[1], [0], [0], [1], [0, 0, 1, 1], [], []>} : vector<8x4xbf16>, vector<4x288xbf16>, vector<8x288xf32> -> vector<8x288xf32>
    %97 = arith.addf %92, %96 : vector<8x288xf32>
    %98 = vector.extract_strided_slice %61 {offsets = [0, 37], sizes = [4, 288], strides = [1, 1]} : vector<4x326xbf16> to vector<4x288xbf16>
    %c7_68 = arith.constant 7 : index
    %c0_69 = arith.constant 0 : index
    %c0_70 = arith.constant 0 : index
    %99 = vector.load %arg3[%c7_68, %c0_69, %c0_70] : memref<9x8x4xbf16, #tpu.memory_space<vmem>>, vector<1x8x4xbf16>
    %100 = vector.shape_cast %99 : vector<1x8x4xbf16> to vector<8x4xbf16>
    %cst_71 = arith.constant dense<0.000000e+00> : vector<8x288xf32>
    %101 = tpu.matmul %100, %98, %cst_71 {dimension_numbers = #tpu.dot_dimension_numbers<[1], [0], [0], [1], [0, 0, 1, 1], [], []>} : vector<8x4xbf16>, vector<4x288xbf16>, vector<8x288xf32> -> vector<8x288xf32>
    %102 = arith.addf %97, %101 : vector<8x288xf32>
    %103 = vector.extract_strided_slice %61 {offsets = [0, 38], sizes = [4, 288], strides = [1, 1]} : vector<4x326xbf16> to vector<4x288xbf16>
    %c8_72 = arith.constant 8 : index
    %c0_73 = arith.constant 0 : index
    %c0_74 = arith.constant 0 : index
    %104 = vector.load %arg3[%c8_72, %c0_73, %c0_74] : memref<9x8x4xbf16, #tpu.memory_space<vmem>>, vector<1x8x4xbf16>
    %105 = vector.shape_cast %104 : vector<1x8x4xbf16> to vector<8x4xbf16>
    %cst_75 = arith.constant dense<0.000000e+00> : vector<8x288xf32>
    %106 = tpu.matmul %105, %103, %cst_75 {dimension_numbers = #tpu.dot_dimension_numbers<[1], [0], [0], [1], [0, 0, 1, 1], [], []>} : vector<8x4xbf16>, vector<4x288xbf16>, vector<8x288xf32> -> vector<8x288xf32>
    %107 = arith.addf %102, %106 : vector<8x288xf32>
    %108 = vector.broadcast %0 : vector<1x288xf32> to vector<8x288xf32>
    %109 = arith.mulf %107, %108 : vector<8x288xf32>
    %cst_76 = arith.constant dense<0.000000e+00> : vector<8xf32>
    %110 = vector.multi_reduction <add>, %109, %cst_76 [1] : vector<8x288xf32> to vector<8xf32>
    %111 = vector.shape_cast %110 : vector<8xf32> to vector<8x1xf32>
    %112 = arith.addf %55, %111 : vector<8x1xf32>
    %113 = arith.mulf %109, %107 : vector<8x288xf32>
    %cst_77 = arith.constant dense<0.000000e+00> : vector<8xf32>
    %114 = vector.multi_reduction <add>, %113, %cst_77 [1] : vector<8x288xf32> to vector<8xf32>
    %115 = vector.shape_cast %114 : vector<8xf32> to vector<8x1xf32>
    %116 = arith.addf %59, %115 : vector<8x1xf32>
    %cst_78 = arith.constant 0.001953125 : f32
    %117 = vector.broadcast %cst_78 : f32 to vector<8x1xf32>
    %118 = arith.mulf %112, %117 : vector<8x1xf32>
    %cst_79 = arith.constant 0.001953125 : f32
    %119 = vector.broadcast %cst_79 : f32 to vector<8x1xf32>
    %120 = arith.mulf %116, %119 : vector<8x1xf32>
    %121 = arith.mulf %118, %118 : vector<8x1xf32>
    %122 = arith.subf %120, %121 : vector<8x1xf32>
    %cst_80 = arith.constant 9.99999974E-6 : f32
    %123 = vector.broadcast %cst_80 : f32 to vector<8x1xf32>
    %124 = arith.addf %122, %123 : vector<8x1xf32>
    %125 = math.rsqrt %124 : vector<8x1xf32>
    %c0_81 = arith.constant 0 : index
    %c0_82 = arith.constant 0 : index
    %126 = vector.load %arg4[%c0_81, %c0_82] : memref<8x1xf32, #tpu.memory_space<vmem>>, vector<8x1xf32>
    %127 = arith.mulf %126, %125 : vector<8x1xf32>
    %c0_83 = arith.constant 0 : index
    %c0_84 = arith.constant 0 : index
    %128 = vector.load %arg5[%c0_83, %c0_84] : memref<8x1xf32, #tpu.memory_space<vmem>>, vector<8x1xf32>
    %129 = arith.mulf %118, %127 : vector<8x1xf32>
    %130 = arith.subf %128, %129 : vector<8x1xf32>
    %cst_85 = arith.constant 0.000000e+00 : bf16
    %131 = vector.broadcast %cst_85 : bf16 to vector<8x326xbf16>
    %c0_86 = arith.constant 0 : index
    %c0_87 = arith.constant 0 : index
    %132 = vector.load %arg10[%c0_86, %c0_87] : memref<8x326xbf16, #tpu.memory_space<vmem>>, vector<8x326xbf16>
    tpu.vector_store %arg10[%c0_86, %c0_87], %131 {strides = array<i32>} : memref<8x326xbf16, #tpu.memory_space<vmem>>, vector<8x326xbf16>,
    %cst_88 = arith.constant 0.000000e+00 : f32
    %133 = vector.broadcast %cst_88 : f32 to vector<8x1xf32>
    %cst_89 = arith.constant 0.000000e+00 : f32
    %134 = vector.broadcast %cst_89 : f32 to vector<8x1xf32>
    %135 = vector.broadcast %127 : vector<8x1xf32> to vector<8x288xf32>
    %136 = arith.mulf %50, %135 : vector<8x288xf32>
    %137 = vector.broadcast %130 : vector<8x1xf32> to vector<8x288xf32>
    %138 = arith.addf %136, %137 : vector<8x288xf32>
    %cst_90 = arith.constant 0.000000e+00 : f32
    %139 = vector.broadcast %cst_90 : f32 to vector<8x288xf32>
    %140 = arith.maximumf %138, %139 : vector<8x288xf32>
    %141 = vector.broadcast %0 : vector<1x288xf32> to vector<8x288xf32>
    %142 = arith.mulf %140, %141 : vector<8x288xf32>
    %143 = arith.truncf %142 : vector<8x288xf32> to vector<8x288xbf16>
    %c0_91 = arith.constant 0 : index
    %c19 = arith.constant 19 : index
    %144 = vector.load %arg10[%c0_91, %c19] : memref<8x326xbf16, #tpu.memory_space<vmem>>, vector<8x288xbf16>
    tpu.vector_store %arg10[%c0_91, %c19], %143 {strides = array<i32>} : memref<8x326xbf16, #tpu.memory_space<vmem>>, vector<8x288xbf16>,
    %c0_92 = arith.constant 0 : index
    %c0_93 = arith.constant 0 : index
    %145 = vector.load %arg10[%c0_92, %c0_93] : memref<8x326xbf16, #tpu.memory_space<vmem>>, vector<8x326xbf16>
    %cst_94 = arith.constant 0.000000e+00 : f32
    %146 = vector.broadcast %cst_94 : f32 to vector<8x288xf32>
    %147 = vector.extract_strided_slice %145 {offsets = [0, 0], sizes = [8, 288], strides = [1, 1]} : vector<8x326xbf16> to vector<8x288xbf16>
    %c0_95 = arith.constant 0 : index
    %c0_96 = arith.constant 0 : index
    %c0_97 = arith.constant 0 : index
    %148 = vector.load %arg6[%c0_95, %c0_96, %c0_97] : memref<9x8x8xbf16, #tpu.memory_space<vmem>>, vector<1x8x8xbf16>
    %149 = vector.shape_cast %148 : vector<1x8x8xbf16> to vector<8x8xbf16>
    %cst_98 = arith.constant dense<0.000000e+00> : vector<8x288xf32>
    %150 = tpu.matmul %149, %147, %cst_98 {dimension_numbers = #tpu.dot_dimension_numbers<[1], [0], [0], [1], [0, 0, 1, 1], [], []>} : vector<8x8xbf16>, vector<8x288xbf16>, vector<8x288xf32> -> vector<8x288xf32>
    %151 = arith.addf %146, %150 : vector<8x288xf32>
    %152 = vector.extract_strided_slice %145 {offsets = [0, 1], sizes = [8, 288], strides = [1, 1]} : vector<8x326xbf16> to vector<8x288xbf16>
    %c1_99 = arith.constant 1 : index
    %c0_100 = arith.constant 0 : index
    %c0_101 = arith.constant 0 : index
    %153 = vector.load %arg6[%c1_99, %c0_100, %c0_101] : memref<9x8x8xbf16, #tpu.memory_space<vmem>>, vector<1x8x8xbf16>
    %154 = vector.shape_cast %153 : vector<1x8x8xbf16> to vector<8x8xbf16>
    %cst_102 = arith.constant dense<0.000000e+00> : vector<8x288xf32>
    %155 = tpu.matmul %154, %152, %cst_102 {dimension_numbers = #tpu.dot_dimension_numbers<[1], [0], [0], [1], [0, 0, 1, 1], [], []>} : vector<8x8xbf16>, vector<8x288xbf16>, vector<8x288xf32> -> vector<8x288xf32>
    %156 = arith.addf %151, %155 : vector<8x288xf32>
    %157 = vector.extract_strided_slice %145 {offsets = [0, 2], sizes = [8, 288], strides = [1, 1]} : vector<8x326xbf16> to vector<8x288xbf16>
    %c2_103 = arith.constant 2 : index
    %c0_104 = arith.constant 0 : index
    %c0_105 = arith.constant 0 : index
    %158 = vector.load %arg6[%c2_103, %c0_104, %c0_105] : memref<9x8x8xbf16, #tpu.memory_space<vmem>>, vector<1x8x8xbf16>
    %159 = vector.shape_cast %158 : vector<1x8x8xbf16> to vector<8x8xbf16>
    %cst_106 = arith.constant dense<0.000000e+00> : vector<8x288xf32>
    %160 = tpu.matmul %159, %157, %cst_106 {dimension_numbers = #tpu.dot_dimension_numbers<[1], [0], [0], [1], [0, 0, 1, 1], [], []>} : vector<8x8xbf16>, vector<8x288xbf16>, vector<8x288xf32> -> vector<8x288xf32>
    %161 = arith.addf %156, %160 : vector<8x288xf32>
    %162 = vector.extract_strided_slice %145 {offsets = [0, 18], sizes = [8, 288], strides = [1, 1]} : vector<8x326xbf16> to vector<8x288xbf16>
    %c3_107 = arith.constant 3 : index
    %c0_108 = arith.constant 0 : index
    %c0_109 = arith.constant 0 : index
    %163 = vector.load %arg6[%c3_107, %c0_108, %c0_109] : memref<9x8x8xbf16, #tpu.memory_space<vmem>>, vector<1x8x8xbf16>
    %164 = vector.shape_cast %163 : vector<1x8x8xbf16> to vector<8x8xbf16>
    %cst_110 = arith.constant dense<0.000000e+00> : vector<8x288xf32>
    %165 = tpu.matmul %164, %162, %cst_110 {dimension_numbers = #tpu.dot_dimension_numbers<[1], [0], [0], [1], [0, 0, 1, 1], [], []>} : vector<8x8xbf16>, vector<8x288xbf16>, vector<8x288xf32> -> vector<8x288xf32>
    %166 = arith.addf %161, %165 : vector<8x288xf32>
    %167 = vector.extract_strided_slice %145 {offsets = [0, 19], sizes = [8, 288], strides = [1, 1]} : vector<8x326xbf16> to vector<8x288xbf16>
    %c4_111 = arith.constant 4 : index
    %c0_112 = arith.constant 0 : index
    %c0_113 = arith.constant 0 : index
    %168 = vector.load %arg6[%c4_111, %c0_112, %c0_113] : memref<9x8x8xbf16, #tpu.memory_space<vmem>>, vector<1x8x8xbf16>
    %169 = vector.shape_cast %168 : vector<1x8x8xbf16> to vector<8x8xbf16>
    %cst_114 = arith.constant dense<0.000000e+00> : vector<8x288xf32>
    %170 = tpu.matmul %169, %167, %cst_114 {dimension_numbers = #tpu.dot_dimension_numbers<[1], [0], [0], [1], [0, 0, 1, 1], [], []>} : vector<8x8xbf16>, vector<8x288xbf16>, vector<8x288xf32> -> vector<8x288xf32>
    %171 = arith.addf %166, %170 : vector<8x288xf32>
    %172 = vector.extract_strided_slice %145 {offsets = [0, 20], sizes = [8, 288], strides = [1, 1]} : vector<8x326xbf16> to vector<8x288xbf16>
    %c5_115 = arith.constant 5 : index
    %c0_116 = arith.constant 0 : index
    %c0_117 = arith.constant 0 : index
    %173 = vector.load %arg6[%c5_115, %c0_116, %c0_117] : memref<9x8x8xbf16, #tpu.memory_space<vmem>>, vector<1x8x8xbf16>
    %174 = vector.shape_cast %173 : vector<1x8x8xbf16> to vector<8x8xbf16>
    %cst_118 = arith.constant dense<0.000000e+00> : vector<8x288xf32>
    %175 = tpu.matmul %174, %172, %cst_118 {dimension_numbers = #tpu.dot_dimension_numbers<[1], [0], [0], [1], [0, 0, 1, 1], [], []>} : vector<8x8xbf16>, vector<8x288xbf16>, vector<8x288xf32> -> vector<8x288xf32>
    %176 = arith.addf %171, %175 : vector<8x288xf32>
    %177 = vector.extract_strided_slice %145 {offsets = [0, 36], sizes = [8, 288], strides = [1, 1]} : vector<8x326xbf16> to vector<8x288xbf16>
    %c6_119 = arith.constant 6 : index
    %c0_120 = arith.constant 0 : index
    %c0_121 = arith.constant 0 : index
    %178 = vector.load %arg6[%c6_119, %c0_120, %c0_121] : memref<9x8x8xbf16, #tpu.memory_space<vmem>>, vector<1x8x8xbf16>
    %179 = vector.shape_cast %178 : vector<1x8x8xbf16> to vector<8x8xbf16>
    %cst_122 = arith.constant dense<0.000000e+00> : vector<8x288xf32>
    %180 = tpu.matmul %179, %177, %cst_122 {dimension_numbers = #tpu.dot_dimension_numbers<[1], [0], [0], [1], [0, 0, 1, 1], [], []>} : vector<8x8xbf16>, vector<8x288xbf16>, vector<8x288xf32> -> vector<8x288xf32>
    %181 = arith.addf %176, %180 : vector<8x288xf32>
    %182 = vector.extract_strided_slice %145 {offsets = [0, 37], sizes = [8, 288], strides = [1, 1]} : vector<8x326xbf16> to vector<8x288xbf16>
    %c7_123 = arith.constant 7 : index
    %c0_124 = arith.constant 0 : index
    %c0_125 = arith.constant 0 : index
    %183 = vector.load %arg6[%c7_123, %c0_124, %c0_125] : memref<9x8x8xbf16, #tpu.memory_space<vmem>>, vector<1x8x8xbf16>
    %184 = vector.shape_cast %183 : vector<1x8x8xbf16> to vector<8x8xbf16>
    %cst_126 = arith.constant dense<0.000000e+00> : vector<8x288xf32>
    %185 = tpu.matmul %184, %182, %cst_126 {dimension_numbers = #tpu.dot_dimension_numbers<[1], [0], [0], [1], [0, 0, 1, 1], [], []>} : vector<8x8xbf16>, vector<8x288xbf16>, vector<8x288xf32> -> vector<8x288xf32>
    %186 = arith.addf %181, %185 : vector<8x288xf32>
    %187 = vector.extract_strided_slice %145 {offsets = [0, 38], sizes = [8, 288], strides = [1, 1]} : vector<8x326xbf16> to vector<8x288xbf16>
    %c8_127 = arith.constant 8 : index
    %c0_128 = arith.constant 0 : index
    %c0_129 = arith.constant 0 : index
    %188 = vector.load %arg6[%c8_127, %c0_128, %c0_129] : memref<9x8x8xbf16, #tpu.memory_space<vmem>>, vector<1x8x8xbf16>
    %189 = vector.shape_cast %188 : vector<1x8x8xbf16> to vector<8x8xbf16>
    %cst_130 = arith.constant dense<0.000000e+00> : vector<8x288xf32>
    %190 = tpu.matmul %189, %187, %cst_130 {dimension_numbers = #tpu.dot_dimension_numbers<[1], [0], [0], [1], [0, 0, 1, 1], [], []>} : vector<8x8xbf16>, vector<8x288xbf16>, vector<8x288xf32> -> vector<8x288xf32>
    %191 = arith.addf %186, %190 : vector<8x288xf32>
    %192 = vector.broadcast %0 : vector<1x288xf32> to vector<8x288xf32>
    %193 = arith.mulf %191, %192 : vector<8x288xf32>
    %cst_131 = arith.constant dense<0.000000e+00> : vector<8xf32>
    %194 = vector.multi_reduction <add>, %193, %cst_131 [1] : vector<8x288xf32> to vector<8xf32>
    %195 = vector.shape_cast %194 : vector<8xf32> to vector<8x1xf32>
    %196 = arith.addf %133, %195 : vector<8x1xf32>
    %197 = arith.mulf %193, %191 : vector<8x288xf32>
    %cst_132 = arith.constant dense<0.000000e+00> : vector<8xf32>
    %198 = vector.multi_reduction <add>, %197, %cst_132 [1] : vector<8x288xf32> to vector<8xf32>
    %199 = vector.shape_cast %198 : vector<8xf32> to vector<8x1xf32>
    %200 = arith.addf %134, %199 : vector<8x1xf32>
    %201 = vector.broadcast %127 : vector<8x1xf32> to vector<8x288xf32>
    %202 = arith.mulf %107, %201 : vector<8x288xf32>
    %203 = vector.broadcast %130 : vector<8x1xf32> to vector<8x288xf32>
    %204 = arith.addf %202, %203 : vector<8x288xf32>
    %cst_133 = arith.constant 0.000000e+00 : f32
    %205 = vector.broadcast %cst_133 : f32 to vector<8x288xf32>
    %206 = arith.maximumf %204, %205 : vector<8x288xf32>
    %207 = vector.broadcast %0 : vector<1x288xf32> to vector<8x288xf32>
    %208 = arith.mulf %206, %207 : vector<8x288xf32>
    %209 = arith.truncf %208 : vector<8x288xf32> to vector<8x288xbf16>
    %c0_134 = arith.constant 0 : index
    %c19_135 = arith.constant 19 : index
    %210 = vector.load %arg10[%c0_134, %c19_135] : memref<8x326xbf16, #tpu.memory_space<vmem>>, vector<8x288xbf16>
    tpu.vector_store %arg10[%c0_134, %c19_135], %209 {strides = array<i32>} : memref<8x326xbf16, #tpu.memory_space<vmem>>, vector<8x288xbf16>,
    %c0_136 = arith.constant 0 : index
    %c0_137 = arith.constant 0 : index
    %211 = vector.load %arg10[%c0_136, %c0_137] : memref<8x326xbf16, #tpu.memory_space<vmem>>, vector<8x326xbf16>
    %cst_138 = arith.constant 0.000000e+00 : f32
    %212 = vector.broadcast %cst_138 : f32 to vector<8x288xf32>
    %213 = vector.extract_strided_slice %211 {offsets = [0, 0], sizes = [8, 288], strides = [1, 1]} : vector<8x326xbf16> to vector<8x288xbf16>
    %c0_139 = arith.constant 0 : index
    %c0_140 = arith.constant 0 : index
    %c0_141 = arith.constant 0 : index
    %214 = vector.load %arg6[%c0_139, %c0_140, %c0_141] : memref<9x8x8xbf16, #tpu.memory_space<vmem>>, vector<1x8x8xbf16>
    %215 = vector.shape_cast %214 : vector<1x8x8xbf16> to vector<8x8xbf16>
    %cst_142 = arith.constant dense<0.000000e+00> : vector<8x288xf32>
    %216 = tpu.matmul %215, %213, %cst_142 {dimension_numbers = #tpu.dot_dimension_numbers<[1], [0], [0], [1], [0, 0, 1, 1], [], []>} : vector<8x8xbf16>, vector<8x288xbf16>, vector<8x288xf32> -> vector<8x288xf32>
    %217 = arith.addf %212, %216 : vector<8x288xf32>
    %218 = vector.extract_strided_slice %211 {offsets = [0, 1], sizes = [8, 288], strides = [1, 1]} : vector<8x326xbf16> to vector<8x288xbf16>
    %c1_143 = arith.constant 1 : index
    %c0_144 = arith.constant 0 : index
    %c0_145 = arith.constant 0 : index
    %219 = vector.load %arg6[%c1_143, %c0_144, %c0_145] : memref<9x8x8xbf16, #tpu.memory_space<vmem>>, vector<1x8x8xbf16>
    %220 = vector.shape_cast %219 : vector<1x8x8xbf16> to vector<8x8xbf16>
    %cst_146 = arith.constant dense<0.000000e+00> : vector<8x288xf32>
    %221 = tpu.matmul %220, %218, %cst_146 {dimension_numbers = #tpu.dot_dimension_numbers<[1], [0], [0], [1], [0, 0, 1, 1], [], []>} : vector<8x8xbf16>, vector<8x288xbf16>, vector<8x288xf32> -> vector<8x288xf32>
    %222 = arith.addf %217, %221 : vector<8x288xf32>
    %223 = vector.extract_strided_slice %211 {offsets = [0, 2], sizes = [8, 288], strides = [1, 1]} : vector<8x326xbf16> to vector<8x288xbf16>
    %c2_147 = arith.constant 2 : index
    %c0_148 = arith.constant 0 : index
    %c0_149 = arith.constant 0 : index
    %224 = vector.load %arg6[%c2_147, %c0_148, %c0_149] : memref<9x8x8xbf16, #tpu.memory_space<vmem>>, vector<1x8x8xbf16>
    %225 = vector.shape_cast %224 : vector<1x8x8xbf16> to vector<8x8xbf16>
    %cst_150 = arith.constant dense<0.000000e+00> : vector<8x288xf32>
    %226 = tpu.matmul %225, %223, %cst_150 {dimension_numbers = #tpu.dot_dimension_numbers<[1], [0], [0], [1], [0, 0, 1, 1], [], []>} : vector<8x8xbf16>, vector<8x288xbf16>, vector<8x288xf32> -> vector<8x288xf32>
    %227 = arith.addf %222, %226 : vector<8x288xf32>
    %228 = vector.extract_strided_slice %211 {offsets = [0, 18], sizes = [8, 288], strides = [1, 1]} : vector<8x326xbf16> to vector<8x288xbf16>
    %c3_151 = arith.constant 3 : index
    %c0_152 = arith.constant 0 : index
    %c0_153 = arith.constant 0 : index
    %229 = vector.load %arg6[%c3_151, %c0_152, %c0_153] : memref<9x8x8xbf16, #tpu.memory_space<vmem>>, vector<1x8x8xbf16>
    %230 = vector.shape_cast %229 : vector<1x8x8xbf16> to vector<8x8xbf16>
    %cst_154 = arith.constant dense<0.000000e+00> : vector<8x288xf32>
    %231 = tpu.matmul %230, %228, %cst_154 {dimension_numbers = #tpu.dot_dimension_numbers<[1], [0], [0], [1], [0, 0, 1, 1], [], []>} : vector<8x8xbf16>, vector<8x288xbf16>, vector<8x288xf32> -> vector<8x288xf32>
    %232 = arith.addf %227, %231 : vector<8x288xf32>
    %233 = vector.extract_strided_slice %211 {offsets = [0, 19], sizes = [8, 288], strides = [1, 1]} : vector<8x326xbf16> to vector<8x288xbf16>
    %c4_155 = arith.constant 4 : index
    %c0_156 = arith.constant 0 : index
    %c0_157 = arith.constant 0 : index
    %234 = vector.load %arg6[%c4_155, %c0_156, %c0_157] : memref<9x8x8xbf16, #tpu.memory_space<vmem>>, vector<1x8x8xbf16>
    %235 = vector.shape_cast %234 : vector<1x8x8xbf16> to vector<8x8xbf16>
    %cst_158 = arith.constant dense<0.000000e+00> : vector<8x288xf32>
    %236 = tpu.matmul %235, %233, %cst_158 {dimension_numbers = #tpu.dot_dimension_numbers<[1], [0], [0], [1], [0, 0, 1, 1], [], []>} : vector<8x8xbf16>, vector<8x288xbf16>, vector<8x288xf32> -> vector<8x288xf32>
    %237 = arith.addf %232, %236 : vector<8x288xf32>
    %238 = vector.extract_strided_slice %211 {offsets = [0, 20], sizes = [8, 288], strides = [1, 1]} : vector<8x326xbf16> to vector<8x288xbf16>
    %c5_159 = arith.constant 5 : index
    %c0_160 = arith.constant 0 : index
    %c0_161 = arith.constant 0 : index
    %239 = vector.load %arg6[%c5_159, %c0_160, %c0_161] : memref<9x8x8xbf16, #tpu.memory_space<vmem>>, vector<1x8x8xbf16>
    %240 = vector.shape_cast %239 : vector<1x8x8xbf16> to vector<8x8xbf16>
    %cst_162 = arith.constant dense<0.000000e+00> : vector<8x288xf32>
    %241 = tpu.matmul %240, %238, %cst_162 {dimension_numbers = #tpu.dot_dimension_numbers<[1], [0], [0], [1], [0, 0, 1, 1], [], []>} : vector<8x8xbf16>, vector<8x288xbf16>, vector<8x288xf32> -> vector<8x288xf32>
    %242 = arith.addf %237, %241 : vector<8x288xf32>
    %243 = vector.extract_strided_slice %211 {offsets = [0, 36], sizes = [8, 288], strides = [1, 1]} : vector<8x326xbf16> to vector<8x288xbf16>
    %c6_163 = arith.constant 6 : index
    %c0_164 = arith.constant 0 : index
    %c0_165 = arith.constant 0 : index
    %244 = vector.load %arg6[%c6_163, %c0_164, %c0_165] : memref<9x8x8xbf16, #tpu.memory_space<vmem>>, vector<1x8x8xbf16>
    %245 = vector.shape_cast %244 : vector<1x8x8xbf16> to vector<8x8xbf16>
    %cst_166 = arith.constant dense<0.000000e+00> : vector<8x288xf32>
    %246 = tpu.matmul %245, %243, %cst_166 {dimension_numbers = #tpu.dot_dimension_numbers<[1], [0], [0], [1], [0, 0, 1, 1], [], []>} : vector<8x8xbf16>, vector<8x288xbf16>, vector<8x288xf32> -> vector<8x288xf32>
    %247 = arith.addf %242, %246 : vector<8x288xf32>
    %248 = vector.extract_strided_slice %211 {offsets = [0, 37], sizes = [8, 288], strides = [1, 1]} : vector<8x326xbf16> to vector<8x288xbf16>
    %c7_167 = arith.constant 7 : index
    %c0_168 = arith.constant 0 : index
    %c0_169 = arith.constant 0 : index
    %249 = vector.load %arg6[%c7_167, %c0_168, %c0_169] : memref<9x8x8xbf16, #tpu.memory_space<vmem>>, vector<1x8x8xbf16>
    %250 = vector.shape_cast %249 : vector<1x8x8xbf16> to vector<8x8xbf16>
    %cst_170 = arith.constant dense<0.000000e+00> : vector<8x288xf32>
    %251 = tpu.matmul %250, %248, %cst_170 {dimension_numbers = #tpu.dot_dimension_numbers<[1], [0], [0], [1], [0, 0, 1, 1], [], []>} : vector<8x8xbf16>, vector<8x288xbf16>, vector<8x288xf32> -> vector<8x288xf32>
    %252 = arith.addf %247, %251 : vector<8x288xf32>
    %253 = vector.extract_strided_slice %211 {offsets = [0, 38], sizes = [8, 288], strides = [1, 1]} : vector<8x326xbf16> to vector<8x288xbf16>
    %c8_171 = arith.constant 8 : index
    %c0_172 = arith.constant 0 : index
    %c0_173 = arith.constant 0 : index
    %254 = vector.load %arg6[%c8_171, %c0_172, %c0_173] : memref<9x8x8xbf16, #tpu.memory_space<vmem>>, vector<1x8x8xbf16>
    %255 = vector.shape_cast %254 : vector<1x8x8xbf16> to vector<8x8xbf16>
    %cst_174 = arith.constant dense<0.000000e+00> : vector<8x288xf32>
    %256 = tpu.matmul %255, %253, %cst_174 {dimension_numbers = #tpu.dot_dimension_numbers<[1], [0], [0], [1], [0, 0, 1, 1], [], []>} : vector<8x8xbf16>, vector<8x288xbf16>, vector<8x288xf32> -> vector<8x288xf32>
    %257 = arith.addf %252, %256 : vector<8x288xf32>
    %258 = vector.broadcast %0 : vector<1x288xf32> to vector<8x288xf32>
    %259 = arith.mulf %257, %258 : vector<8x288xf32>
    %cst_175 = arith.constant dense<0.000000e+00> : vector<8xf32>
    %260 = vector.multi_reduction <add>, %259, %cst_175 [1] : vector<8x288xf32> to vector<8xf32>
    %261 = vector.shape_cast %260 : vector<8xf32> to vector<8x1xf32>
    %262 = arith.addf %196, %261 : vector<8x1xf32>
    %263 = arith.mulf %259, %257 : vector<8x288xf32>
    %cst_176 = arith.constant dense<0.000000e+00> : vector<8xf32>
    %264 = vector.multi_reduction <add>, %263, %cst_176 [1] : vector<8x288xf32> to vector<8xf32>
    %265 = vector.shape_cast %264 : vector<8xf32> to vector<8x1xf32>
    %266 = arith.addf %200, %265 : vector<8x1xf32>
    %cst_177 = arith.constant 0.001953125 : f32
    %267 = vector.broadcast %cst_177 : f32 to vector<8x1xf32>
    %268 = arith.mulf %262, %267 : vector<8x1xf32>
    %cst_178 = arith.constant 0.001953125 : f32
    %269 = vector.broadcast %cst_178 : f32 to vector<8x1xf32>
    %270 = arith.mulf %266, %269 : vector<8x1xf32>
    %271 = arith.mulf %268, %268 : vector<8x1xf32>
    %272 = arith.subf %270, %271 : vector<8x1xf32>
    %cst_179 = arith.constant 9.99999974E-6 : f32
    %273 = vector.broadcast %cst_179 : f32 to vector<8x1xf32>
    %274 = arith.addf %272, %273 : vector<8x1xf32>
    %275 = math.rsqrt %274 : vector<8x1xf32>
    %c0_180 = arith.constant 0 : index
    %c0_181 = arith.constant 0 : index
    %276 = vector.load %arg7[%c0_180, %c0_181] : memref<8x1xf32, #tpu.memory_space<vmem>>, vector<8x1xf32>
    %277 = arith.mulf %276, %275 : vector<8x1xf32>
    %c0_182 = arith.constant 0 : index
    %c0_183 = arith.constant 0 : index
    %278 = vector.load %arg8[%c0_182, %c0_183] : memref<8x1xf32, #tpu.memory_space<vmem>>, vector<8x1xf32>
    %279 = arith.mulf %268, %277 : vector<8x1xf32>
    %280 = arith.subf %278, %279 : vector<8x1xf32>
    %281 = vector.broadcast %277 : vector<8x1xf32> to vector<8x288xf32>
    %282 = arith.mulf %191, %281 : vector<8x288xf32>
    %283 = vector.broadcast %280 : vector<8x1xf32> to vector<8x288xf32>
    %284 = arith.addf %282, %283 : vector<8x288xf32>
    %cst_184 = arith.constant 0.000000e+00 : f32
    %285 = vector.broadcast %cst_184 : f32 to vector<8x288xf32>
    %286 = arith.maximumf %284, %285 : vector<8x288xf32>
    %c0_185 = arith.constant 0 : index
    %c0_186 = arith.constant 0 : index
    %c0_187 = arith.constant 0 : index
    %287 = vector.load %arg9[%c0_185, %c0_186, %c0_187] : memref<2x8x288xf32, #tpu.memory_space<vmem>>, vector<1x8x288xf32>
    %288 = vector.shape_cast %287 : vector<1x8x288xf32> to vector<8x288xf32>
    %289 = vector.shape_cast %286 : vector<8x288xf32> to vector<1x8x288xf32>
    tpu.vector_store %arg9[%c0_185, %c0_186, %c0_187], %289 {strides = array<i32>} : memref<2x8x288xf32, #tpu.memory_space<vmem>>, vector<1x8x288xf32>,
    %290 = vector.broadcast %277 : vector<8x1xf32> to vector<8x288xf32>
    %291 = arith.mulf %257, %290 : vector<8x288xf32>
    %292 = vector.broadcast %280 : vector<8x1xf32> to vector<8x288xf32>
    %293 = arith.addf %291, %292 : vector<8x288xf32>
    %cst_188 = arith.constant 0.000000e+00 : f32
    %294 = vector.broadcast %cst_188 : f32 to vector<8x288xf32>
    %295 = arith.maximumf %293, %294 : vector<8x288xf32>
    %c1_189 = arith.constant 1 : index
    %c0_190 = arith.constant 0 : index
    %c0_191 = arith.constant 0 : index
    %296 = vector.load %arg9[%c1_189, %c0_190, %c0_191] : memref<2x8x288xf32, #tpu.memory_space<vmem>>, vector<1x8x288xf32>
    %297 = vector.shape_cast %296 : vector<1x8x288xf32> to vector<8x288xf32>
    %298 = vector.shape_cast %295 : vector<8x288xf32> to vector<1x8x288xf32>
    tpu.vector_store %arg9[%c1_189, %c0_190, %c0_191], %298 {strides = array<i32>} : memref<2x8x288xf32, #tpu.memory_space<vmem>>, vector<1x8x288xf32>,
    return
  }
  func.func @transform_0(%arg0: i32) -> (i32, i32) {
    %c0_i32 = arith.constant 0 : i32
    %c0_i32_0 = arith.constant 0 : i32
    %c0_i32_1 = arith.constant 0 : i32
    return %c0_i32, %c0_i32_0 : i32, i32
  }
  func.func @transform_1(%arg0: i32) -> (i32, i32, i32) {
    %c0_i32 = arith.constant 0 : i32
    %c0_i32_0 = arith.constant 0 : i32
    %c0_i32_1 = arith.constant 0 : i32
    %c0_i32_2 = arith.constant 0 : i32
    return %c0_i32, %c0_i32_0, %c0_i32_1 : i32, i32, i32
  }
  func.func @transform_2(%arg0: i32) -> (i32, i32, i32) {
    %c0_i32 = arith.constant 0 : i32
    %c0_i32_0 = arith.constant 0 : i32
    %c0_i32_1 = arith.constant 0 : i32
    %c0_i32_2 = arith.constant 0 : i32
    return %c0_i32, %c0_i32_0, %c0_i32_1 : i32, i32, i32
  }
  func.func @transform_3(%arg0: i32) -> (i32, i32) {
    %c0_i32 = arith.constant 0 : i32
    %c0_i32_0 = arith.constant 0 : i32
    %c0_i32_1 = arith.constant 0 : i32
    return %c0_i32, %c0_i32_0 : i32, i32
  }
  func.func @transform_4(%arg0: i32) -> (i32, i32) {
    %c0_i32 = arith.constant 0 : i32
    %c0_i32_0 = arith.constant 0 : i32
    %c0_i32_1 = arith.constant 0 : i32
    return %c0_i32, %c0_i32_0 : i32, i32
  }
  func.func @transform_5(%arg0: i32) -> (i32, i32, i32) {
    %c0_i32 = arith.constant 0 : i32
    %c0_i32_0 = arith.constant 0 : i32
    %c0_i32_1 = arith.constant 0 : i32
    %c0_i32_2 = arith.constant 0 : i32
    return %c0_i32, %c0_i32_0, %c0_i32_1 : i32, i32, i32
  }
  func.func @transform_6(%arg0: i32) -> (i32, i32) {
    %c0_i32 = arith.constant 0 : i32
    %c0_i32_0 = arith.constant 0 : i32
    %c0_i32_1 = arith.constant 0 : i32
    return %c0_i32, %c0_i32_0 : i32, i32
  }
  func.func @transform_7(%arg0: i32) -> (i32, i32) {
    %c0_i32 = arith.constant 0 : i32
    %c0_i32_0 = arith.constant 0 : i32
    %c0_i32_1 = arith.constant 0 : i32
    return %c0_i32, %c0_i32_0 : i32, i32
  }
  func.func @transform_8(%arg0: i32) -> (i32, i32, i32) {
    %c0_i32 = arith.constant 0 : i32
    %c0_i32_0 = arith.constant 0 : i32
    %c0_i32_1 = arith.constant 0 : i32
    %c0_i32_2 = arith.constant 0 : i32
    return %c0_i32, %c0_i32_0, %c0_i32_1 : i32, i32, i32
  }
}

</mosaic_0001>

<bundles_post_ra>
// kernel: double_block_forward.1
= control target key start
LH: loop header
LB: loop body
LE: loop exit
PB: predicated region body
PF: predicated region fallthrough
CT: control target
= control target key end

     0   :  { %s2757_s29 = smov 127   ;;  %s2758_s30 = smov 126   ;;  %vm56_vm0 = vcmask 1041408   ;;  %vm52_vm1 = vcmask 31744   ;;  %vm172_vm2 = vcmask 1031168   ;;  %vm49_vm3 = vcmask 1039360   ;;  %s3600_s1 = inlined_call_operand.vmem [shape: bf16[2,4,326], index: 1, kind: input, shape index: {}]   ;;  %s3601_s2 = inlined_call_operand.vmem [shape: bf16[9,8,4], index: 2, kind: input, shape index: {}]   ;;  %s3602_s0 = inlined_call_operand.vmem [shape: f32[1,288], index: 0, kind: input, shape index: {}]   ;;  %s3603_s3 = inlined_call_operand.vmem [shape: f32[8,1], index: 3, kind: input, shape index: {}]   ;;  %s3604_s4 = inlined_call_operand.vmem [shape: f32[8,1], index: 4, kind: input, shape index: {}]   ;;  %s3605_s5 = inlined_call_operand.vmem [shape: bf16[9,8,8], index: 5, kind: input, shape index: {}]   ;;  %s3606_s6 = inlined_call_operand.vmem [shape: f32[8,1], index: 6, kind: input, shape index: {}]   ;;  %s3607_s7 = inlined_call_operand.vmem [shape: f32[8,1], index: 7, kind: input, shape index: {}]   ;;  %s3608_s8 = inlined_call_operand.vmem [shape: f32[2,8,288], index: 8, kind: output, shape index: {}]  }
   0x1   :  { %v31_v0 = vld [vmem:[%s3600_s1] sm:$0x3f]  ;;  %s2759_s9 = smov 110   ;;  %s2760_s10 = smov 109   ;;  %v2845_v25 = vld [vmem:[%s3600_s1 + $0x6] sm:$0x3f] }
   0x2   :  { %36 = vst [vmem:[#allocation1] ss:$4 sm:$0xff] %v31_v0  ;;  %s2761_s11 = smov 108   ;;  %s2762_s12 = smov 92   ;;  %v2866_v36 = vld [vmem:[%s3601_s2] sm:$0xf] }
   0x3   :  { %s2763_s13 = smov 91   ;;  %s2764_s16 = smov 90   ;;  %v2883_v47 = vld [vmem:[%s3601_s2 + $0x4] sm:$0xf]  ;;  %v2896_v54 = vld [vmem:[%s3601_s2 + $0x8] sm:$0xf] }
   0x4   :  { %vm244_vm4 = vcmask 900096   ;;  %vm316_vm5 = vcmask 891904   ;;  %vm388_vm6 = vcmask 883712   ;;  %vm460_vm7 = vcmask 752640  }
   0x5   :  { %vm532_vm8 = vcmask 744448   ;;  %vm604_vm9 = vcmask 736256   ;;  %vm672_vm10 = vcmask 261120   ;;  %vm1303_vm14 = vcmask 568320  }
   0x6   :  { %vm1341_vm15 = vcmask 1043608  }
   0x9   :  { %v37_v1 = vld.sshfl [vmem:[#allocation1] sm:$0xff pattern:$0x73625140]  ;;  %v41_v2 = vld.sshfl [vmem:[#allocation1 + $0x10] sm:$0xff pattern:$0x73625140] }
   0xa   :  { %43 = vrot.lane.b32.xlu0 %v37_v1, %s2757_s29  ;;  %47 = vrot.lane.b32.xlu1 %v41_v2, %s2757_s29  ;;  %v39_v3 = vld.sshfl [vmem:[#allocation1 + $0x8] sm:$0xff pattern:$0x73625140] }
   0xb   :  { %105 = vst [vmem:[#allocation1] ss:$4 sm:$0xff] %v31_v0 }
  0x12   :  { %45 = vrot.lane.b32.xlu0 %v39_v3, %s2757_s29  ;;  %v2818_v4 = vld.sshfl [vmem:[#allocation1] sm:$0xff pattern:$0x73625140]  ;;  %v2820_v5 = vld.sshfl [vmem:[#allocation1 + $0x8] sm:$0xff pattern:$0x73625140] }
  0x13   :  { %v2822_v6 = vld.sshfl [vmem:[#allocation1 + $0x10] sm:$0xff pattern:$0x73625140]  ;;  %v112_v32 = vsel %vm56_vm0, %v2818_v4, 0  ;;  %v114_v58 = vsel %vm56_vm0, %v2820_v5, 0 }
  0x14   :  { %159 = vst [vmem:[#allocation1] ss:$4 sm:$0xff] %v31_v0  ;;  %125 = vmatpush.bf16.msra.mxu3 %v112_v32  ;;  %v116_v59 = vsel %vm56_vm0, %v2822_v6, 0 }
  0x17   :  { %2609 = vmatmul.msk.bf16.vlgmr.msra.gmra.mxu3 %vm52_vm1, %v2866_v36 }
  0x1b   :  { %v160_v7 = vld.sshfl [vmem:[#allocation1] sm:$0xff pattern:$0x73625140]  ;;  %v162_v8 = vld.sshfl [vmem:[#allocation1 + $0x8] sm:$0xff pattern:$0x73625140] }
  0x1c   :  { %v164_v9 = vld.sshfl [vmem:[#allocation1 + $0x10] sm:$0xff pattern:$0x73625140]  ;;  %166 = vrot.lane.b32.xlu1 %v160_v7, %s2758_s30  ;;  %168 = vrot.lane.b32.xlu2 %v162_v8, %s2758_s30  ;;  %v2923_v7 = vld [vmem:[%s3601_s2 + $0xc] sm:$0xf] }
  0x1d   :  { %231 = vst [vmem:[#allocation1] ss:$4 sm:$0xff] %v31_v0 }
  0x24   :  { %v234_v10 = vld.sshfl [vmem:[#allocation1 + $0x8] sm:$0xff pattern:$0x73625140]  ;;  %v236_v11 = vld.sshfl [vmem:[#allocation1 + $0x10] sm:$0xff pattern:$0x73625140]  ;;  %170 = vrot.lane.b32.xlu2 %v164_v9, %s2758_s30 }
  0x25   :  { %240 = vrot.lane.b32.xlu1 %v234_v10, %s2759_s9  ;;  %v232_v12 = vld.sshfl [vmem:[#allocation1] sm:$0xff pattern:$0x73625140] }
  0x26   :  { %238 = vrot.lane.b32.xlu0 %v232_v12, %s2759_s9  ;;  %303 = vst [vmem:[#allocation1] ss:$4 sm:$0xff] %v31_v0 }
  0x2c   :  { %242 = vrot.lane.b32.xlu2 %v236_v11, %s2759_s9 }
  0x2d   :  { %v306_v13 = vld.sshfl [vmem:[#allocation1 + $0x8] sm:$0xff pattern:$0x73625140]  ;;  %v308_v14 = vld.sshfl [vmem:[#allocation1 + $0x10] sm:$0xff pattern:$0x73625140] }
  0x2e   :  { %312 = vrot.lane.b32.xlu1 %v306_v13, %s2760_s10  ;;  %v304_v15 = vld.sshfl [vmem:[#allocation1] sm:$0xff pattern:$0x73625140] }
  0x2f   :  { %310 = vrot.lane.b32.xlu0 %v304_v15, %s2760_s10  ;;  %375 = vst [vmem:[#allocation1] ss:$4 sm:$0xff] %v31_v0 }
  0x34   :  { %314 = vrot.lane.b32.xlu2 %v308_v14, %s2760_s10 }
  0x36   :  { %v378_v16 = vld.sshfl [vmem:[#allocation1 + $0x8] sm:$0xff pattern:$0x73625140]  ;;  %v380_v17 = vld.sshfl [vmem:[#allocation1 + $0x10] sm:$0xff pattern:$0x73625140] }
  0x37   :  { %384 = vrot.lane.b32.xlu1 %v378_v16, %s2761_s11  ;;  %v376_v18 = vld.sshfl [vmem:[#allocation1] sm:$0xff pattern:$0x73625140] }
  0x38   :  { %382 = vrot.lane.b32.xlu0 %v376_v18, %s2761_s11  ;;  %447 = vst [vmem:[#allocation1] ss:$4 sm:$0xff] %v31_v0 }
  0x3c   :  { %386 = vrot.lane.b32.xlu2 %v380_v17, %s2761_s11 }
  0x3f   :  { %v450_v19 = vld.sshfl [vmem:[#allocation1 + $0x8] sm:$0xff pattern:$0x73625140]  ;;  %v452_v20 = vld.sshfl [vmem:[#allocation1 + $0x10] sm:$0xff pattern:$0x73625140] }
  0x40   :  { %456 = vrot.lane.b32.xlu1 %v450_v19, %s2762_s12  ;;  %v448_v21 = vld.sshfl [vmem:[#allocation1] sm:$0xff pattern:$0x73625140] }
  0x41   :  { %454 = vrot.lane.b32.xlu0 %v448_v21, %s2762_s12  ;;  %519 = vst [vmem:[#allocation1] ss:$4 sm:$0xff] %v31_v0 }
  0x44   :  { %458 = vrot.lane.b32.xlu2 %v452_v20, %s2762_s12 }
  0x48   :  { %v522_v22 = vld.sshfl [vmem:[#allocation1 + $0x8] sm:$0xff pattern:$0x73625140]  ;;  %v524_v23 = vld.sshfl [vmem:[#allocation1 + $0x10] sm:$0xff pattern:$0x73625140] }
  0x49   :  { %528 = vrot.lane.b32.xlu1 %v522_v22, %s2763_s13  ;;  %v520_v24 = vld.sshfl [vmem:[#allocation1] sm:$0xff pattern:$0x73625140] }
  0x4a   :  { %526 = vrot.lane.b32.xlu0 %v520_v24, %s2763_s13  ;;  %591 = vst [vmem:[#allocation1] ss:$4 sm:$0xff] %v31_v0 }
  0x4c   :  { %530 = vrot.lane.b32.xlu2 %v524_v23, %s2763_s13 }
  0x51   :  { %v594_v26 = vld.sshfl [vmem:[#allocation1 + $0x8] sm:$0xff pattern:$0x73625140]  ;;  %v596_v27 = vld.sshfl [vmem:[#allocation1 + $0x10] sm:$0xff pattern:$0x73625140] }
  0x52   :  { %600 = vrot.lane.b32.xlu1 %v594_v26, %s2764_s16  ;;  %v592_v28 = vld.sshfl [vmem:[#allocation1] sm:$0xff pattern:$0x73625140] }
  0x53   :  { %598 = vrot.lane.b32.xlu0 %v592_v28, %s2764_s16  ;;  %690 = vst [vmem:[#allocation1] ss:$4 sm:$0xff] %v2845_v25 }
  0x54   :  { %602 = vrot.lane.b32.xlu2 %v596_v27, %s2764_s16 }
  0x5a   :  { %v693_v29 = vld.sshfl [vmem:[#allocation1 + $0x8] sm:$0xff pattern:$0x73625140]  ;;  %v695_v30 = vld.sshfl [vmem:[#allocation1 + $0x10] sm:$0xff pattern:$0x73625140] }
  0x5b   :  { %699 = vrot.lane.b32.xlu1 %v693_v29, %s2757_s29  ;;  %v691_v31 = vld.sshfl [vmem:[#allocation1] sm:$0xff pattern:$0x73625140] }
  0x5c   :  { %697 = vrot.lane.b32.xlu0 %v691_v31, %s2757_s29  ;;  %753 = vst [vmem:[#allocation1] ss:$4 sm:$0xff] %v2845_v25  ;;  %701 = vrot.lane.b32.xlu2 %v695_v30, %s2757_s29 }
  0x63   :  { %v2857_v33 = vld.sshfl [vmem:[#allocation1] sm:$0xff pattern:$0x73625140]  ;;  %v2859_v34 = vld.sshfl [vmem:[#allocation1 + $0x8] sm:$0xff pattern:$0x73625140] }
  0x64   :  { %v2861_v35 = vld.sshfl [vmem:[#allocation1 + $0x10] sm:$0xff pattern:$0x73625140] }
  0x65   :  { %802 = vst [vmem:[#allocation1] ss:$4 sm:$0xff] %v2845_v25 }
  0x6c   :  { %v805_v37 = vld.sshfl [vmem:[#allocation1 + $0x8] sm:$0xff pattern:$0x73625140]  ;;  %v807_v38 = vld.sshfl [vmem:[#allocation1 + $0x10] sm:$0xff pattern:$0x73625140] }
  0x6d   :  { %811 = vrot.lane.b32.xlu1 %v805_v37, %s2758_s30  ;;  %813 = vrot.lane.b32.xlu2 %v807_v38, %s2758_s30  ;;  %v803_v39 = vld.sshfl [vmem:[#allocation1] sm:$0xff pattern:$0x73625140] }
  0x6e   :  { %809 = vrot.lane.b32.xlu0 %v803_v39, %s2758_s30  ;;  %868 = vst [vmem:[#allocation1] ss:$4 sm:$0xff] %v2845_v25 }
  0x75   :  { %v871_v41 = vld.sshfl [vmem:[#allocation1 + $0x8] sm:$0xff pattern:$0x73625140]  ;;  %v873_v42 = vld.sshfl [vmem:[#allocation1 + $0x10] sm:$0xff pattern:$0x73625140] }
  0x76   :  { %v169_v40 = vpop.permute.xlu2 %168  ;;  %877 = vrot.lane.b32.xlu1 %v871_v41, %s2759_s9  ;;  %v869_v43 = vld.sshfl [vmem:[#allocation1] sm:$0xff pattern:$0x73625140]  ;;  %879 = vrot.lane.b32.xlu2 %v873_v42, %s2759_s9  ;;  %v2964_v42 = vld [vmem:[%s3601_s2 + $0x14] sm:$0xf] }
  0x77   :  { %875 = vrot.lane.b32.xlu0 %v869_v43, %s2759_s9  ;;  %934 = vst [vmem:[#allocation1] ss:$4 sm:$0xff] %v2845_v25 }
  0x7c   :  { %v44_v44 = vpop.permute.xlu0 %43  ;;  %v48_v45 = vpop.permute.xlu1 %47 }
  0x7d   :  { %v64_v46 = vsel %vm56_vm0, %v48_v45, 0 }
  0x7e   :  { %99 = vmatpush.bf16.msra.mxu2 %v64_v46  ;;  %v171_v48 = vpop.permute.xlu2 %170  ;;  %v939_v50 = vld.sshfl [vmem:[#allocation1 + $0x10] sm:$0xff pattern:$0x73625140]  ;;  %v937_v52 = vld.sshfl [vmem:[#allocation1 + $0x8] sm:$0xff pattern:$0x73625140] }
  0x7f   :  { %v174_v49 = vsel %vm172_vm2, %v169_v40, %v171_v48  ;;  %945 = vrot.lane.b32.xlu2 %v939_v50, %s2760_s10  ;;  %v935_v53 = vld.sshfl [vmem:[#allocation1] sm:$0xff pattern:$0x73625140]  ;;  %943 = vrot.lane.b32.xlu1 %v937_v52, %s2760_s10  ;;  %v185_v0 = vsel %vm56_vm0, %v171_v48, 0 }
  0x80   :  { %v182_v51 = vsel %vm56_vm0, %v174_v49, 0  ;;  %941 = vrot.lane.b32.xlu0 %v935_v53, %s2760_s10  ;;  %1000 = vst [vmem:[#allocation1] ss:$4 sm:$0xff] %v2845_v25 }
  0x81   :  { %2608 = vmatmul.msk.bf16.vlgmr.msra.gmra.mxu2 %vm52_vm1, %v2883_v47  ;;  %207 = vmatpush.bf16.msrb.mxu3 %v182_v51 }
  0x84   :  { %v46_v55 = vpop.permute.xlu0 %45  ;;  %2614 = vmatmul.msk.bf16.vlgmr.msrb.gmra.mxu3 %vm52_vm1, %v2896_v54 }
  0x85   :  { %v50_v56 = vsel %vm49_vm3, %v44_v44, %v46_v55  ;;  %v51_v57 = vsel %vm49_vm3, %v46_v55, %v48_v45  ;;  %v2973_v44 = vld [vmem:[%s3601_s2 + $0x10] sm:$0xf] }
  0x86   :  { %v58_v60 = vsel %vm56_vm0, %v50_v56, 0  ;;  %v61_v61 = vsel %vm56_vm0, %v51_v57, 0  ;;  %v243_v62 = vpop.permute.xlu2 %242 }
  0x87   :  { %73 = vmatpush.bf16.msra.mxu0 %v58_v60  ;;  %86 = vmatpush.bf16.msra.mxu1 %v61_v61  ;;  %v257_v63 = vsel %vm56_vm0, %v243_v62, 0  ;;  %v1005_v1 = vld.sshfl [vmem:[#allocation1 + $0x10] sm:$0xff pattern:$0x73625140] }
  0x88   :  { %292 = vmatpush.bf16.msra.mxu3 %v257_v63  ;;  %v1003_v2 = vld.sshfl [vmem:[#allocation1 + $0x8] sm:$0xff pattern:$0x73625140]  ;;  %v1001_v3 = vld.sshfl [vmem:[#allocation1] sm:$0xff pattern:$0x73625140]  ;;  %1011 = vrot.lane.b32.xlu2 %v1005_v1, %s2761_s11 }
  0x89   :  { %1009 = vrot.lane.b32.xlu1 %v1003_v2, %s2761_s11  ;;  %1066 = vst [vmem:[#allocation1] ss:$4 sm:$0xff] %v2845_v25  ;;  %1007 = vrot.lane.b32.xlu0 %v1001_v3, %s2761_s11 }
  0x8a   :  { %2606 = vmatmul.msk.bf16.vlgmr.msra.gmra.mxu0 %vm52_vm1, %v2883_v47  ;;  %2607 = vmatmul.msk.bf16.vlgmr.msra.gmra.mxu1 %vm52_vm1, %v2883_v47 }
  0x8b   :  { %138 = vmatpush.bf16.msrb.mxu0 %v114_v58  ;;  %151 = vmatpush.bf16.msrb.mxu1 %v116_v59 }
  0x8e   :  { %v167_v4 = vpop.permute.xlu1 %166  ;;  %v315_v9 = vpop.permute.xlu2 %314 }
  0x8f   :  { %220 = vmatpush.bf16.msra.mxu0 %v185_v0  ;;  %v173_v5 = vsel %vm172_vm2, %v167_v4, %v169_v40  ;;  %v329_v15 = vsel %vm56_vm0, %v315_v9, 0 }
  0x90   :  { %v179_v6 = vsel %vm56_vm0, %v173_v5, 0  ;;  %v1071_v8 = vld.sshfl [vmem:[#allocation1 + $0x10] sm:$0xff pattern:$0x73625140] }
  0x91   :  { %194 = vmatpush.bf16.msrb.mxu2 %v179_v6  ;;  %1077 = vrot.lane.b32.xlu2 %v1071_v8, %s2762_s12  ;;  %v1069_v17 = vld.sshfl [vmem:[#allocation1 + $0x8] sm:$0xff pattern:$0x73625140]  ;;  %v1067_v18 = vld.sshfl [vmem:[#allocation1] sm:$0xff pattern:$0x73625140] }
  0x92   :  { %1075 = vrot.lane.b32.xlu1 %v1069_v17, %s2762_s12  ;;  %1132 = vst [vmem:[#allocation1] ss:$4 sm:$0xff] %v2845_v25  ;;  %1073 = vrot.lane.b32.xlu0 %v1067_v18, %s2762_s12 }
  0x94   :  { %2613 = vmatmul.msk.bf16.vlgmr.msrb.gmra.mxu2 %vm52_vm1, %v2896_v54  ;;  %2619 = vmatmul.msk.bf16.vlgmr.msra.gmra.mxu3 %vm52_vm1, %v2923_v7 }
  0x96   :  { %v387_v20 = vpop.permute.xlu2 %386 }
  0x97   :  { %v241_v10 = vpop.permute.xlu1 %240  ;;  %v401_v30 = vsel %vm56_vm0, %v387_v20, 0 }
  0x98   :  { %v246_v11 = vsel %vm244_vm4, %v241_v10, %v243_v62  ;;  %v239_v12 = vpop.permute.xlu0 %238  ;;  %v2994_v62 = vld [vmem:[%s3601_s2 + $0x18] sm:$0xf] }
  0x99   :  { %v254_v13 = vsel %vm56_vm0, %v246_v11, 0  ;;  %v245_v14 = vsel %vm244_vm4, %v239_v12, %v241_v10  ;;  %v1137_v27 = vld.sshfl [vmem:[#allocation1 + $0x10] sm:$0xff pattern:$0x73625140]  ;;  %v3012_v10 = vld [vmem:[%s3601_s2 + $0x1c] sm:$0xf] }
  0x9a   :  { %2610 = vmatmul.msk.bf16.vlgmr.msrb.gmra.mxu0 %vm52_vm1, %v2866_v36  ;;  %2611 = vmatmul.msk.bf16.vlgmr.msrb.gmra.mxu1 %vm52_vm1, %v2866_v36  ;;  %v251_v16 = vsel %vm56_vm0, %v245_v14, 0  ;;  %v1135_v28 = vld.sshfl [vmem:[#allocation1 + $0x8] sm:$0xff pattern:$0x73625140]  ;;  %v759_v12 = vsel %vm56_vm0, %v2859_v34, 0 }
  0x9b   :  { %279 = vmatpush.bf16.msra.mxu2 %v254_v13  ;;  %266 = vmatpush.bf16.msra.mxu1 %v251_v16  ;;  %v1133_v29 = vld.sshfl [vmem:[#allocation1] sm:$0xff pattern:$0x73625140] }
  0x9c   :  { %1141 = vrot.lane.b32.xlu1 %v1135_v28, %s2763_s13  ;;  %1139 = vrot.lane.b32.xlu0 %v1133_v29, %s2763_s13  ;;  %1198 = vst [vmem:[#allocation1] ss:$4 sm:$0xff] %v2845_v25  ;;  %v127_v28 = vpop.f32.mrf.mxu3  ;;  %v761_v29 = vsel %vm56_vm0, %v2861_v35, 0 }
  0x9d   :  { %1143 = vrot.lane.b32.xlu2 %v1137_v27, %s2763_s13 }
  0x9e   :  { %v459_v38 = vpop.permute.xlu2 %458 }
  0x9f   :  { %364 = vmatpush.bf16.msrb.mxu2 %v329_v15  ;;  %v473_v55 = vsel %vm56_vm0, %v459_v38, 0  ;;  %v757_v15 = vsel %vm56_vm0, %v2857_v33, 0 }
  0xa0   :  { %v313_v19 = vpop.permute.xlu1 %312 }
  0xa1   :  { %v311_v21 = vpop.permute.xlu0 %310  ;;  %v318_v22 = vsel %vm316_vm5, %v313_v19, %v315_v9 }
  0xa2   :  { %v317_v23 = vsel %vm316_vm5, %v311_v21, %v313_v19  ;;  %v326_v24 = vsel %vm56_vm0, %v318_v22, 0  ;;  %v3039_v22 = vld [vmem:[%s3601_s2 + $0x20] sm:$0xf] }
  0xa3   :  { %v323_v26 = vsel %vm56_vm0, %v317_v23, 0  ;;  %351 = vmatpush.bf16.msrb.mxu1 %v326_v24  ;;  %v1201_v41 = vld.sshfl [vmem:[#allocation1 + $0x8] sm:$0xff pattern:$0x73625140] }
  0xa4   :  { %2618 = vmatmul.msk.bf16.vlgmr.msra.gmra.mxu2 %vm52_vm1, %v2923_v7  ;;  %338 = vmatpush.bf16.msrb.mxu0 %v323_v26  ;;  %v1199_v43 = vld.sshfl [vmem:[#allocation1] sm:$0xff pattern:$0x73625140]  ;;  %v1203_v16 = vld.sshfl [vmem:[#allocation1 + $0x10] sm:$0xff pattern:$0x73625140] }
  0xa5   :  { %1207 = vrot.lane.b32.xlu1 %v1201_v41, %s2764_s16  ;;  %1205 = vrot.lane.b32.xlu0 %v1199_v43, %s2764_s16 }
  0xa6   :  { %v531_v46 = vpop.permute.xlu2 %530  ;;  %1209 = vrot.lane.b32.xlu2 %v1203_v16, %s2764_s16 }
  0xa7   :  { %v545_v50 = vsel %vm56_vm0, %v531_v46, 0 }
  0xa9   :  { %v385_v31 = vpop.permute.xlu1 %384 }
  0xaa   :  { %2615 = vmatmul.msk.bf16.vlgmr.msra.gmra.mxu0 %vm52_vm1, %v2896_v54  ;;  %2617 = vmatmul.msk.bf16.vlgmr.msra.gmra.mxu1 %vm52_vm1, %v2923_v7  ;;  %v383_v32 = vpop.permute.xlu0 %382  ;;  %v390_v37 = vsel %vm388_vm6, %v385_v31, %v387_v20 }
  0xab   :  { %v389_v39 = vsel %vm388_vm6, %v383_v32, %v385_v31  ;;  %v398_v25 = vsel %vm56_vm0, %v390_v37, 0  ;;  %436 = vmatpush.bf16.msra.mxu1 %v401_v30  ;;  %v129_v37 = vpop.f32.mrf.mxu3 }
  0xac   :  { %v395_v40 = vsel %vm56_vm0, %v389_v39, 0  ;;  %423 = vmatpush.bf16.msra.mxu0 %v398_v25 }
  0xad   :  { %410 = vmatpush.bf16.msrb.mxu3 %v395_v40 }
  0xae   :  { %v603_v63 = vpop.permute.xlu2 %602 }
  0xaf   :  { %v617_v0 = vsel %vm56_vm0, %v603_v63, 0 }
  0xb0   :  { %2625 = vmatmul.msk.bf16.vlgmr.msrb.gmra.mxu3 %vm52_vm1, %v2964_v42 }
  0xb2   :  { %v457_v45 = vpop.permute.xlu1 %456 }
  0xb3   :  { %v455_v48 = vpop.permute.xlu0 %454  ;;  %v462_v49 = vsel %vm460_vm7, %v457_v45, %v459_v38 }
  0xb4   :  { %2623 = vmatmul.msk.bf16.vlgmr.msrb.gmra.mxu2 %vm52_vm1, %v2973_v44  ;;  %v461_v51 = vsel %vm460_vm7, %v455_v48, %v457_v45  ;;  %v470_v52 = vsel %vm56_vm0, %v462_v49, 0 }
  0xb5   :  { %v467_v53 = vsel %vm56_vm0, %v461_v51, 0  ;;  %495 = vmatpush.bf16.msra.mxu3 %v470_v52 }
  0xb6   :  { %482 = vmatpush.bf16.msra.mxu2 %v467_v53  ;;  %v702_v14 = vpop.permute.xlu2 %701 }
  0xb7   :  { %v712_v18 = vsel %vm56_vm0, %v702_v14, 0 }
  0xb9   :  { %580 = vmatpush.bf16.msrb.mxu3 %v545_v50 }
  0xba   :  { %2621 = vmatmul.msk.bf16.vlgmr.msrb.gmra.mxu0 %vm52_vm1, %v2973_v44  ;;  %2622 = vmatmul.msk.bf16.vlgmr.msrb.gmra.mxu1 %vm52_vm1, %v2973_v44 }
  0xbb   :  { %v529_v56 = vpop.permute.xlu1 %528  ;;  %508 = vmatpush.bf16.msrb.mxu0 %v473_v55 }
  0xbc   :  { %v534_v57 = vsel %vm532_vm8, %v529_v56, %v531_v46  ;;  %v527_v58 = vpop.permute.xlu0 %526 }
  0xbd   :  { %v542_v59 = vsel %vm56_vm0, %v534_v57, 0  ;;  %v533_v60 = vsel %vm532_vm8, %v527_v58, %v529_v56 }
  0xbe   :  { %v539_v61 = vsel %vm56_vm0, %v533_v60, 0  ;;  %567 = vmatpush.bf16.msrb.mxu2 %v542_v59 }
  0xbf   :  { %554 = vmatpush.bf16.msrb.mxu1 %v539_v61 }
  0xc0   :  { %2630 = vmatmul.msk.bf16.vlgmr.msra.gmra.mxu3 %vm52_vm1, %v2994_v62 }
  0xc4   :  { %2629 = vmatmul.msk.bf16.vlgmr.msra.gmra.mxu2 %vm52_vm1, %v2994_v62  ;;  %v601_v1 = vpop.permute.xlu1 %600 }
  0xc5   :  { %v599_v2 = vpop.permute.xlu0 %598  ;;  %v606_v3 = vsel %vm604_vm9, %v601_v1, %v603_v63  ;;  %652 = vmatpush.bf16.msra.mxu2 %v617_v0 }
  0xc6   :  { %v605_v4 = vsel %vm604_vm9, %v599_v2, %v601_v1  ;;  %v614_v6 = vsel %vm56_vm0, %v606_v3, 0 }
  0xc7   :  { %v611_v5 = vsel %vm56_vm0, %v605_v4, 0  ;;  %v814_v33 = vpop.permute.xlu2 %813 }
  0xc8   :  { %v824_v19 = vsel %vm56_vm0, %v814_v33, 0 }
  0xca   :  { %2626 = vmatmul.msk.bf16.vlgmr.msra.gmra.mxu0 %vm52_vm1, %v2964_v42  ;;  %2627 = vmatmul.msk.bf16.vlgmr.msra.gmra.mxu1 %vm52_vm1, %v2964_v42 }
  0xcb   :  { %626 = vmatpush.bf16.msra.mxu0 %v611_v5  ;;  %639 = vmatpush.bf16.msra.mxu1 %v614_v6 }
  0xcd   :  { %v700_v8 = vpop.permute.xlu1 %699 }
  0xce   :  { %v698_v9 = vpop.permute.xlu0 %697  ;;  %v704_v17 = vsel %vm49_vm3, %v700_v8, %v702_v14 }
  0xcf   :  { %v703_v11 = vsel %vm49_vm3, %v698_v9, %v700_v8  ;;  %v709_v34 = vsel %vm56_vm0, %v704_v17, 0 }
  0xd0   :  { %2635 = vmatmul.msk.bf16.vlgmr.msrb.gmra.mxu3 %vm52_vm1, %v3012_v10  ;;  %v706_v13 = vsel %vm56_vm0, %v703_v11, 0  ;;  %v880_v32 = vpop.permute.xlu2 %879 }
  0xd1   :  { %721 = vmatpush.bf16.msra.mxu3 %v706_v13  ;;  %v890_v38 = vsel %vm56_vm0, %v880_v32, 0 }
  0xd4   :  { %2634 = vmatmul.msk.bf16.vlgmr.msrb.gmra.mxu2 %vm52_vm1, %v3012_v10 }
  0xd5   :  { %783 = vmatpush.bf16.msrb.mxu3 %v759_v12  ;;  %770 = vmatpush.bf16.msrb.mxu2 %v757_v15 }
  0xd9   :  { %v946_v48 = vpop.permute.xlu2 %945 }
  0xda   :  { %2631 = vmatmul.msk.bf16.vlgmr.msrb.gmra.mxu0 %vm52_vm1, %v2994_v62  ;;  %2633 = vmatmul.msk.bf16.vlgmr.msrb.gmra.mxu1 %vm52_vm1, %v3012_v10  ;;  %v956_v0 = vsel %vm56_vm0, %v946_v48, 0 }
  0xdb   :  { %734 = vmatpush.bf16.msrb.mxu0 %v709_v34  ;;  %747 = vmatpush.bf16.msrb.mxu1 %v712_v18 }
  0xdf   :  { %v812_v20 = vpop.permute.xlu1 %811 }
  0xe0   :  { %2641 = vmatmul.msk.bf16.vlgmr.msra.gmra.mxu3 %vm52_vm1, %v2883_v47  ;;  %v816_v21 = vsel %vm172_vm2, %v812_v20, %v814_v33  ;;  %v810_v23 = vpop.permute.xlu0 %809 }
  0xe1   :  { %859 = vmatpush.bf16.msra.mxu3 %v824_v19  ;;  %v821_v24 = vsel %vm56_vm0, %v816_v21, 0  ;;  %v815_v26 = vsel %vm172_vm2, %v810_v23, %v812_v20 }
  0xe2   :  { %v818_v27 = vsel %vm56_vm0, %v815_v26, 0  ;;  %v1012_v53 = vpop.permute.xlu2 %1011 }
  0xe3   :  { %v1022_v17 = vsel %vm56_vm0, %v1012_v53, 0 }
  0xe4   :  { %2639 = vmatmul.msk.bf16.vlgmr.msra.gmra.mxu2 %vm52_vm1, %v3039_v22 }
  0xe5   :  { %846 = vmatpush.bf16.msra.mxu2 %v821_v24 }
  0xe8   :  { %v878_v30 = vpop.permute.xlu1 %877 }
  0xe9   :  { %v876_v31 = vpop.permute.xlu0 %875  ;;  %v882_v40 = vsel %vm244_vm4, %v878_v30, %v880_v32 }
  0xea   :  { %2637 = vmatmul.msk.bf16.vlgmr.msra.gmra.mxu0 %vm52_vm1, %v3039_v22  ;;  %2638 = vmatmul.msk.bf16.vlgmr.msra.gmra.mxu1 %vm52_vm1, %v3039_v22  ;;  %v881_v25 = vsel %vm244_vm4, %v876_v31, %v878_v30  ;;  %v887_v46 = vsel %vm56_vm0, %v882_v40, 0 }
  0xeb   :  { %796 = vmatpush.bf16.msra.mxu0 %v761_v29  ;;  %833 = vmatpush.bf16.msra.mxu1 %v818_v27  ;;  %v884_v45 = vsel %vm56_vm0, %v881_v25, 0  ;;  %v1078_v2 = vpop.permute.xlu2 %1077 }
  0xec   :  { %v1088_v3 = vsel %vm56_vm0, %v1078_v2, 0 }
  0xf0   :  { %2645 = vmatmul.msk.bf16.vlgmr.msrb.gmra.mxu3 %vm52_vm1, %v2866_v36 }
  0xf1   :  { %v944_v35 = vpop.permute.xlu1 %943 }
  0xf2   :  { %v942_v39 = vpop.permute.xlu0 %941  ;;  %v948_v57 = vsel %vm316_vm5, %v944_v35, %v946_v48 }
  0xf3   :  { %v947_v41 = vsel %vm316_vm5, %v942_v39, %v944_v35  ;;  %v953_v63 = vsel %vm56_vm0, %v948_v57, 0 }
  0xf4   :  { %2644 = vmatmul.msk.bf16.vlgmr.msrb.gmra.mxu2 %vm52_vm1, %v2866_v36  ;;  %v950_v43 = vsel %vm56_vm0, %v947_v41, 0 }
  0xf5   :  { %925 = vmatpush.bf16.msrb.mxu2 %v890_v38  ;;  %965 = vmatpush.bf16.msrb.mxu3 %v950_v43 }
  0xfa   :  { %2642 = vmatmul.msk.bf16.vlgmr.msrb.gmra.mxu0 %vm52_vm1, %v2883_v47  ;;  %2643 = vmatmul.msk.bf16.vlgmr.msrb.gmra.mxu1 %vm52_vm1, %v2883_v47 }
  0xfb   :  { %899 = vmatpush.bf16.msrb.mxu0 %v884_v45  ;;  %912 = vmatpush.bf16.msrb.mxu1 %v887_v46  ;;  %v1010_v49 = vpop.permute.xlu1 %1009  ;;  %v1008_v50 = vpop.permute.xlu0 %1007 }
  0xfc   :  { %v1013_v51 = vsel %vm388_vm6, %v1008_v50, %v1010_v49  ;;  %v1014_v55 = vsel %vm388_vm6, %v1010_v49, %v1012_v53 }
  0xfd   :  { %v1016_v52 = vsel %vm56_vm0, %v1013_v51, 0  ;;  %v1019_v47 = vsel %vm56_vm0, %v1014_v55, 0 }
 0x100   :  { %2649 = vmatmul.msk.bf16.vlgmr.msra.gmra.mxu3 %vm52_vm1, %v2896_v54 }
 0x101   :  { %1044 = vmatpush.bf16.msra.mxu3 %v1019_v47 }
 0x104   :  { %2648 = vmatmul.msk.bf16.vlgmr.msra.gmra.mxu2 %vm52_vm1, %v2896_v54  ;;  %v101_v56 = vpop.f32.mrf.mxu2  ;;  %v1076_v4 = vpop.permute.xlu1 %1075 }
 0x105   :  { %1031 = vmatpush.bf16.msra.mxu2 %v1016_v52  ;;  %v1080_v8 = vsel %vm460_vm7, %v1076_v4, %v1078_v2  ;;  %v1074_v11 = vpop.permute.xlu0 %1073 }
 0x107   :  { %v75_v58 = vpop.f32.mrf.mxu0  ;;  %v88_v59 = vpop.f32.mrf.mxu1 }
 0x108   :  { %v128_v60 = vadd.f32 %v127_v28, %v75_v58  ;;  %v209_v61 = vpop.f32.mrf.mxu3  ;;  %v1144_v28 = vpop.permute.xlu2 %1143 }
 0x109   :  { %v1154_v29 = vsel %vm56_vm0, %v1144_v28, 0 }
 0x10a   :  { %2646 = vmatmul.msk.bf16.vlgmr.msra.gmra.mxu0 %vm52_vm1, %v2866_v36  ;;  %2647 = vmatmul.msk.bf16.vlgmr.msra.gmra.mxu1 %vm52_vm1, %v2896_v54  ;;  %v1085_v36 = vsel %vm56_vm0, %v1080_v8, 0  ;;  %v1079_v54 = vsel %vm460_vm7, %v1074_v11, %v1076_v4 }
 0x10b   :  { %978 = vmatpush.bf16.msra.mxu0 %v953_v63  ;;  %991 = vmatpush.bf16.msra.mxu1 %v956_v0  ;;  %v1082_v18 = vsel %vm56_vm0, %v1079_v54, 0 }
 0x10c   :  { %v103_v1 = vpop.f32.mrf.mxu2 }
 0x10e   :  { %v1142_v20 = vpop.permute.xlu1 %1141  ;;  %v1140_v21 = vpop.permute.xlu0 %1139 }
 0x10f   :  { %v77_v5 = vpop.f32.mrf.mxu0  ;;  %v90_v6 = vpop.f32.mrf.mxu1  ;;  %v1145_v37 = vsel %vm532_vm8, %v1140_v21, %v1142_v20  ;;  %v1146_v38 = vsel %vm532_vm8, %v1142_v20, %v1144_v28  ;;  %v30_v20 = vld [vmem:[%s3602_s0] sm:$0x7] }
 0x110   :  { %2653 = vmatmul.msk.bf16.vlgmr.msrb.gmra.mxu3 %vm52_vm1, %v2973_v44  ;;  %v211_v9 = vpop.f32.mrf.mxu3  ;;  %v1148_v41 = vsel %vm56_vm0, %v1145_v37, 0  ;;  %v1151_v43 = vsel %vm56_vm0, %v1146_v38, 0  ;;  %v1210_v50 = vpop.permute.xlu2 %1209 }
 0x111   :  { %1123 = vmatpush.bf16.msrb.mxu3 %v1088_v3  ;;  %v1220_v47 = vsel %vm56_vm0, %v1210_v50, 0 }
 0x114   :  { %2652 = vmatmul.msk.bf16.vlgmr.msrb.gmra.mxu2 %vm52_vm1, %v2923_v7 }
 0x115   :  { %1110 = vmatpush.bf16.msrb.mxu2 %v1085_v36 }
 0x117   :  { %v196_v12 = vpop.f32.mrf.mxu2  ;;  %v140_v13 = vpop.f32.mrf.mxu0 }
 0x118   :  { %v3090_v14 = vadd.f32 %v196_v12, %v128_v60  ;;  %v141_v15 = vadd.f32 %v140_v13, %v88_v59  ;;  %v153_v16 = vpop.f32.mrf.mxu1  ;;  %v294_v34 = vpop.f32.mrf.mxu3 }
 0x119   :  { %v154_v33 = vadd.f32 %v153_v16, %v101_v56  ;;  %v1208_v30 = vpop.permute.xlu1 %1207  ;;  %v1206_v31 = vpop.permute.xlu0 %1205 }
 0x11a   :  { %v3094_v19 = vadd.f32 %v209_v61, %v141_v15  ;;  %2650 = vmatmul.msk.bf16.vlgmr.msrb.gmra.mxu0 %vm52_vm1, %v2923_v7  ;;  %2651 = vmatmul.msk.bf16.vlgmr.msrb.gmra.mxu1 %vm52_vm1, %v2923_v7  ;;  %v1211_v32 = vsel %vm604_vm9, %v1206_v31, %v1208_v30  ;;  %v1212_v52 = vsel %vm604_vm9, %v1208_v30, %v1210_v50  ;;  %v3147_v30 = vperm.slane %v30_v20, 1 }
 0x11b   :  { %1057 = vmatpush.bf16.msrb.mxu0 %v1022_v17  ;;  %1097 = vmatpush.bf16.msrb.mxu1 %v1082_v18  ;;  %v1214_v7 = vsel %vm56_vm0, %v1211_v32, 0 }
 0x11f   :  { %v198_v23 = vpop.f32.mrf.mxu2  ;;  %v142_v24 = vpop.f32.mrf.mxu0 }
 0x120   :  { %v155_v26 = vpop.f32.mrf.mxu1  ;;  %2657 = vmatmul.msk.bf16.vlgmr.msra.gmra.mxu3 %vm52_vm1, %v2964_v42  ;;  %v296_v27 = vpop.f32.mrf.mxu3 }
 0x121   :  { %1229 = vmatpush.bf16.msra.mxu3 %v1214_v7  ;;  %v3145_v26 = vperm.slane %v30_v20, 2 }
 0x124   :  { %2656 = vmatmul.msk.bf16.vlgmr.msra.gmra.mxu2 %vm52_vm1, %v2964_v42 }
 0x125   :  { %1189 = vmatpush.bf16.msra.mxu2 %v1154_v29 }
 0x127   :  { %v281_v35 = vpop.f32.mrf.mxu2  ;;  %v222_v39 = vpop.f32.mrf.mxu0 }
 0x128   :  { %v228_v25 = vadd.f32 %v222_v39, %v154_v33  ;;  %v268_v40 = vpop.f32.mrf.mxu1  ;;  %v299_v36 = vadd.f32 %v281_v35, %v3094_v19  ;;  %v3143_v19 = vperm.slane %v30_v20, 0 }
 0x129   :  { %v298_v11 = vadd.f32 %v268_v40, %v3090_v14 }
 0x12a   :  { %v300_v45 = vadd.f32 %v294_v34, %v228_v25  ;;  %2654 = vmatmul.msk.bf16.vlgmr.msra.gmra.mxu0 %vm52_vm1, %v2973_v44  ;;  %2655 = vmatmul.msk.bf16.vlgmr.msra.gmra.mxu1 %vm52_vm1, %v2973_v44  ;;  %v1217_v44 = vsel %vm56_vm0, %v1212_v52, 0  ;;  %vm1342_vm0 = vcmask 1047556  }
 0x12b   :  { %1163 = vmatpush.bf16.msra.mxu0 %v1148_v41  ;;  %1176 = vmatpush.bf16.msra.mxu1 %v1151_v43 }
 0x12f   :  { %v283_v46 = vpop.f32.mrf.mxu2  ;;  %v224_v48 = vpop.f32.mrf.mxu0 }
 0x130   :  { %v270_v49 = vpop.f32.mrf.mxu1  ;;  %2661 = vmatmul.msk.bf16.vlgmr.msrb.gmra.mxu3 %vm52_vm1, %v2994_v62 }
 0x133   :  { %v412_v51 = vpop.f32.mrf.mxu3 }
 0x134   :  { %2660 = vmatmul.msk.bf16.vlgmr.msrb.gmra.mxu2 %vm52_vm1, %v2994_v62 }
 0x137   :  { %v366_v53 = vpop.f32.mrf.mxu2  ;;  %v340_v55 = vpop.f32.mrf.mxu0 }
 0x138   :  { %v353_v56 = vpop.f32.mrf.mxu1  ;;  %v370_v54 = vadd.f32 %v340_v55, %v298_v11 }
 0x139   :  { %v371_v12 = vadd.f32 %v353_v56, %v299_v36 }
 0x13a   :  { %2658 = vmatmul.msk.bf16.vlgmr.msrb.gmra.mxu0 %vm52_vm1, %v2964_v42  ;;  %2659 = vmatmul.msk.bf16.vlgmr.msrb.gmra.mxu1 %vm52_vm1, %v2994_v62  ;;  %v442_v18 = vadd.f32 %v412_v51, %v370_v54 }
 0x13b   :  { %v414_v57 = vpop.f32.mrf.mxu3  ;;  %1242 = vmatpush.bf16.msrb.mxu0 %v1217_v44  ;;  %1255 = vmatpush.bf16.msrb.mxu1 %v1220_v47 }
 0x13f   :  { %v368_v58 = vpop.f32.mrf.mxu2  ;;  %v342_v59 = vpop.f32.mrf.mxu0 }
 0x140   :  { %v355_v60 = vpop.f32.mrf.mxu1  ;;  %2665 = vmatmul.msk.bf16.vlgmr.msra.gmra.mxu3 %vm52_vm1, %v3039_v22 }
 0x143   :  { %v497_v61 = vpop.f32.mrf.mxu3 }
 0x144   :  { %2664 = vmatmul.msk.bf16.vlgmr.msra.gmra.mxu2 %vm52_vm1, %v3012_v10 }
 0x147   :  { %v484_v63 = vpop.f32.mrf.mxu2  ;;  %v425_v0 = vpop.f32.mrf.mxu0 }
 0x148   :  { %v438_v1 = vpop.f32.mrf.mxu1  ;;  %v443_v34 = vadd.f32 %v425_v0, %v371_v12  ;;  %v514_v21 = vadd.f32 %v484_v63, %v442_v18 }
 0x14a   :  { %2662 = vmatmul.msk.bf16.vlgmr.msra.gmra.mxu0 %vm52_vm1, %v3012_v10  ;;  %2663 = vmatmul.msk.bf16.vlgmr.msra.gmra.mxu1 %vm52_vm1, %v3012_v10  ;;  %v372_v10 = vadd.f32 %v366_v53, %v300_v45  ;;  %v515_v23 = vadd.f32 %v497_v61, %v443_v34 }
 0x14b   :  { %v499_v42 = vpop.f32.mrf.mxu3 }
 0x14c   :  { %v444_v16 = vadd.f32 %v438_v1, %v372_v10 }
 0x14f   :  { %v486_v62 = vpop.f32.mrf.mxu2  ;;  %v427_v2 = vpop.f32.mrf.mxu0 }
 0x150   :  { %v440_v3 = vpop.f32.mrf.mxu1 }
 0x153   :  { %v582_v4 = vpop.f32.mrf.mxu3 }
 0x157   :  { %v569_v5 = vpop.f32.mrf.mxu2  ;;  %v510_v6 = vpop.f32.mrf.mxu0 }
 0x158   :  { %v556_v8 = vpop.f32.mrf.mxu1  ;;  %v516_v33 = vadd.f32 %v510_v6, %v444_v16  ;;  %v587_v27 = vadd.f32 %v569_v5, %v515_v23 }
 0x159   :  { %v586_v14 = vadd.f32 %v556_v8, %v514_v21 }
 0x15a   :  { %2666 = vmatmul.msk.bf16.vlgmr.msrb.gmra.mxu0 %vm52_vm1, %v3039_v22  ;;  %2667 = vmatmul.msk.bf16.vlgmr.msrb.gmra.mxu1 %vm52_vm1, %v3039_v22  ;;  %v588_v24 = vadd.f32 %v582_v4, %v516_v33  ;;  %vm1336_vm1 = vcmask 154624  }
 0x15b   :  { %v584_v9 = vpop.f32.mrf.mxu3 }
 0x15f   :  { %v571_v13 = vpop.f32.mrf.mxu2  ;;  %v512_v15 = vpop.f32.mrf.mxu0 }
 0x160   :  { %v558_v17 = vpop.f32.mrf.mxu1 }
 0x163   :  { %v723_v22 = vpop.f32.mrf.mxu3 }
 0x167   :  { %v654_v28 = vpop.f32.mrf.mxu2  ;;  %v628_v29 = vpop.f32.mrf.mxu0 }
 0x168   :  { %v3149_v31 = vadd.f32 %v654_v28, %v588_v24  ;;  %v3151_v32 = vadd.f32 %v628_v29, %v586_v14  ;;  %v641_v7 = vpop.f32.mrf.mxu1 }
 0x169   :  { %v3153_v37 = vadd.f32 %v641_v7, %v587_v27 }
 0x16a   :  { %v668_v38 = vmul.f32 %v3143_v19, %v3151_v32  ;;  %v670_v35 = vmul.f32 %v3145_v26, %v3149_v31 }
 0x16b   :  { %v669_v39 = vmul.f32 %v3147_v30, %v3153_v37  ;;  %v725_v25 = vpop.f32.mrf.mxu3 }
 0x16c   :  { %v678_v40 = vmul.f32 %v668_v38, %v3151_v32  ;;  %v680_v41 = vmul.f32 %v670_v35, %v3149_v31  ;;  %v673_v46 = vsel %vm672_vm10, %v670_v35, 0.0 }
 0x16d   :  { %v679_v43 = vmul.f32 %v669_v39, %v3153_v37  ;;  %v671_v45 = vadd.f32 %v669_v39, %v668_v38 }
 0x16e   :  { %v682_v53 = vsel %vm672_vm10, %v680_v41, 0.0 }
 0x16f   :  { %v656_v48 = vpop.f32.mrf.mxu2  ;;  %v630_v49 = vpop.f32.mrf.mxu0  ;;  %v674_v50 = vadd.f32 %v673_v46, %v671_v45  ;;  %v681_v51 = vadd.f32 %v679_v43, %v678_v40 }
 0x170   :  { %v643_v52 = vpop.f32.mrf.mxu1 }
 0x171   :  { %675 = vadd.xlane.f32.xlu0 %v674_v50  ;;  %v683_v55 = vadd.f32 %v682_v53, %v681_v51 }
 0x173   :  { %684 = vadd.xlane.f32.xlu2 %v683_v55  ;;  %v785_v56 = vpop.f32.mrf.mxu3 }
 0x177   :  { %v772_v44 = vpop.f32.mrf.mxu2  ;;  %v736_v47 = vpop.f32.mrf.mxu0 }
 0x178   :  { %v773_v57 = vadd.f32 %v772_v44, %v723_v22  ;;  %v749_v58 = vpop.f32.mrf.mxu1  ;;  %v786_v59 = vadd.f32 %v785_v56, %v736_v47 }
 0x17b   :  { %v787_v60 = vpop.f32.mrf.mxu3 }
 0x17f   :  { %v774_v61 = vpop.f32.mrf.mxu2  ;;  %v738_v63 = vpop.f32.mrf.mxu0 }
 0x180   :  { %v751_v0 = vpop.f32.mrf.mxu1 }
 0x183   :  { %v861_v1 = vpop.f32.mrf.mxu3 }
 0x187   :  { %v848_v42 = vpop.f32.mrf.mxu2  ;;  %v798_v62 = vpop.f32.mrf.mxu0 }
 0x188   :  { %v866_v2 = vadd.f32 %v848_v42, %v786_v59  ;;  %v799_v3 = vadd.f32 %v798_v62, %v749_v58  ;;  %v835_v4 = vpop.f32.mrf.mxu1 }
 0x189   :  { %v865_v5 = vadd.f32 %v835_v4, %v773_v57 }
 0x18a   :  { %v867_v6 = vadd.f32 %v861_v1, %v799_v3 }
 0x18b   :  { %v863_v8 = vpop.f32.mrf.mxu3 }
 0x18f   :  { %v850_v9 = vpop.f32.mrf.mxu2  ;;  %v800_v11 = vpop.f32.mrf.mxu0 }
 0x190   :  { %v837_v36 = vpop.f32.mrf.mxu1 }
 0x193   :  { %v967_v10 = vpop.f32.mrf.mxu3 }
 0x197   :  { %v927_v54 = vpop.f32.mrf.mxu2  ;;  %v901_v12 = vpop.f32.mrf.mxu0 }
 0x198   :  { %v914_v13 = vpop.f32.mrf.mxu1  ;;  %v931_v41 = vadd.f32 %v901_v12, %v865_v5  ;;  %v933_v52 = vadd.f32 %v927_v54, %v867_v6 }
 0x199   :  { %v932_v50 = vadd.f32 %v914_v13, %v866_v2 }
 0x19a   :  { %v997_v48 = vadd.f32 %v967_v10, %v931_v41 }
 0x19b   :  { %v969_v15 = vpop.f32.mrf.mxu3 }
 0x19f   :  { %v929_v16 = vpop.f32.mrf.mxu2  ;;  %v903_v17 = vpop.f32.mrf.mxu0 }
 0x1a0   :  { %v916_v34 = vpop.f32.mrf.mxu1 }
 0x1a3   :  { %v1046_v18 = vpop.f32.mrf.mxu3 }
 0x1a7   :  { %v1033_v33 = vpop.f32.mrf.mxu2  ;;  %v980_v20 = vpop.f32.mrf.mxu0 }
 0x1a8   :  { %v993_v22 = vpop.f32.mrf.mxu1  ;;  %v1063_v51 = vadd.f32 %v1033_v33, %v997_v48  ;;  %v998_v53 = vadd.f32 %v980_v20, %v932_v50  ;;  %v1299_v48 = vld [vmem:[%s3604_s4] sm:$0xff] }
 0x1a9   :  { %v999_v56 = vadd.f32 %v993_v22, %v933_v52 }
 0x1aa   :  { %v1064_v60 = vadd.f32 %v1046_v18, %v998_v53  ;;  %v2765_v18 = vmov 0  }
 0x1ab   :  { %v1048_v21 = vpop.f32.mrf.mxu3  ;;  %2751 = vset.pattern.permute.xlu0 %v2765_v18  ;;  %1302 = vst [vmem:[#allocation2] sm:$0xff] %v2765_v18  ;;  %2752 = vset.pattern.permute.xlu1 %v2765_v18 }
 0x1ac   :  { %1304 = vst.msk [vmem:[#allocation2 + $0x8] sm:$0xf] %vm1303_vm14, %v2765_v18  ;;  %vm1368_vm14 = vcmask 64512  }
 0x1af   :  { %v1035_v23 = vpop.f32.mrf.mxu2  ;;  %v982_v14 = vpop.f32.mrf.mxu0 }
 0x1b0   :  { %v995_v24 = vpop.f32.mrf.mxu1 }
 0x1b3   :  { %v1125_v27 = vpop.f32.mrf.mxu3 }
 0x1b7   :  { %v1112_v28 = vpop.f32.mrf.mxu2  ;;  %v1059_v29 = vpop.f32.mrf.mxu0 }
 0x1b8   :  { %v1099_v7 = vpop.f32.mrf.mxu1  ;;  %v1065_v59 = vadd.f32 %v1059_v29, %v999_v56  ;;  %v1130_v61 = vadd.f32 %v1112_v28, %v1064_v60 }
 0x1b9   :  { %v1129_v55 = vadd.f32 %v1099_v7, %v1063_v51 }
 0x1ba   :  { %v1131_v0 = vadd.f32 %v1125_v27, %v1065_v59 }
 0x1bb   :  { %v1127_v38 = vpop.f32.mrf.mxu3 }
 0x1bf   :  { %v1114_v35 = vpop.f32.mrf.mxu2  ;;  %v1061_v39 = vpop.f32.mrf.mxu0 }
 0x1c0   :  { %v1101_v25 = vpop.f32.mrf.mxu1 }
 0x1c3   :  { %v1231_v40 = vpop.f32.mrf.mxu3 }
 0x1c7   :  { %v1191_v43 = vpop.f32.mrf.mxu2  ;;  %v1165_v45 = vpop.f32.mrf.mxu0 }
 0x1c8   :  { %v1178_v46 = vpop.f32.mrf.mxu1  ;;  %v1195_v57 = vadd.f32 %v1165_v45, %v1129_v55  ;;  %v1197_v42 = vadd.f32 %v1191_v43, %v1131_v0  ;;  %v1297_v43 = vld [vmem:[%s3603_s3] sm:$0xff]  ;;  %s2766_s3 = smov 19  }
 0x1c9   :  { %v1196_v1 = vadd.f32 %v1178_v46, %v1130_v61 }
 0x1ca   :  { %v3166_v63 = vadd.f32 %v1231_v40, %v1195_v57 }
 0x1cb   :  { %v1233_v49 = vpop.f32.mrf.mxu3 }
 0x1cc   :  { %v1264_v2 = vmul.f32 %v3166_v63, %v3143_v19 }
 0x1ce   :  { %v1273_v9 = vmul.f32 %v1264_v2, %v3166_v63 }
 0x1cf   :  { %v1167_v44 = vpop.f32.mrf.mxu0  ;;  %v1193_v47 = vpop.f32.mrf.mxu2 }
 0x1d0   :  { %v1180_v58 = vpop.f32.mrf.mxu1 }
 0x1d7   :  { %v1244_v62 = vpop.f32.mrf.mxu0 }
 0x1d8   :  { %v3170_v3 = vadd.f32 %v1244_v62, %v1196_v1  ;;  %v1257_v4 = vpop.f32.mrf.mxu1 }
 0x1d9   :  { %v3172_v5 = vadd.f32 %v1257_v4, %v1197_v42 }
 0x1da   :  { %v1265_v6 = vmul.f32 %v3170_v3, %v3147_v30 }
 0x1db   :  { %v1266_v8 = vmul.f32 %v3172_v5, %v3145_v26 }
 0x1dc   :  { %v1274_v11 = vmul.f32 %v1265_v6, %v3170_v3  ;;  %v1267_v36 = vadd.f32 %v1265_v6, %v1264_v2 }
 0x1dd   :  { %v1268_v10 = vsel %vm672_vm10, %v1266_v8, 0.0  ;;  %v1275_v54 = vmul.f32 %v1266_v8, %v3172_v5 }
 0x1de   :  { %v1269_v12 = vadd.f32 %v1268_v10, %v1267_v36  ;;  %v1276_v13 = vadd.f32 %v1274_v11, %v1273_v9 }
 0x1df   :  { %v1246_v15 = vpop.f32.mrf.mxu0  ;;  %v1277_v16 = vsel %vm672_vm10, %v1275_v54, 0.0 }
 0x1e0   :  { %v1259_v17 = vpop.f32.mrf.mxu1  ;;  %1270 = vadd.xlane.f32.xlu1 %v1269_v12  ;;  %v1278_v34 = vadd.f32 %v1277_v16, %v1276_v13 }
 0x1e2   :  { %1279 = vadd.xlane.f32.xlu2 %v1278_v34 }
 0x1e4   :  { %v676_v20 = vpop.xlane.xlu0 %675 }
 0x1e6   :  { %v685_v33 = vpop.xlane.xlu2 %684 }
 0x253   :  { %v1271_v22 = vpop.xlane.xlu1 %1270 }
 0x254   :  { %v1272_v21 = vadd.f32 %v1271_v22, %v676_v20 }
 0x255   :  { %v1280_v23 = vpop.xlane.xlu2 %1279 }
 0x256   :  { %v1282_v14 = vmul.f32 0.001953125, %v1272_v21  ;;  %v1281_v24 = vadd.f32 %v1280_v23, %v685_v33 }
 0x258   :  { %v1284_v27 = vmul.f32 %v1282_v14, %v1282_v14  ;;  %v1283_v28 = vmul.f32 0.001953125, %v1281_v24 }
 0x25a   :  { %v1285_v29 = vsub.f32 %v1283_v28, %v1284_v27  ;;  %v1349_v28 = vld [vmem:[%s3605_s5] sm:$0xf] }
 0x25c   :  { %v1286_v7 = vadd.f32 1e-05, %v1285_v29 }
 0x25e   :  { %2753 = vrsqrt.f32 %v1286_v7  ;;  %vm1293_vm12 = vweird.f32 %v1286_v7 }
 0x264   :  { %v2754_v38 = vpop.eup %2753 }
 0x265   :  { %v1288_v35 = vmul.f32 %v2754_v38, %v1286_v7  ;;  %vm1294_vm11 = vweird.f32 %v2754_v38 }
 0x266   :  { %vm1295_vm13 = vmor %vm1293_vm12, %vm1294_vm11  ;;  %vm1372_vm12 = vcmask 1043456  }
 0x267   :  { %v1289_v39 = vmul.f32 %v2754_v38, %v1288_v35  ;;  %vm3197_vm11 = vmor %vm1342_vm0, %vm1341_vm15 }
 0x269   :  { %v1290_v25 = vmul.f32 0.5, %v1289_v39 }
 0x26b   :  { %v1291_v40 = vsub.f32 1.5, %v1290_v25 }
 0x26d   :  { %v1292_v41 = vmul.f32 %v2754_v38, %v1291_v40 }
 0x26f   :  { %v1296_v45 = vsel %vm1295_vm13, %v2754_v38, %v1292_v41  ;;  %vm1345_vm13 = vcmask 412672  }
 0x270   :  { %v1298_v46 = vmul.f32 %v1297_v43, %v1296_v45  ;;  %v2668_v45 = vld [vmem:[%s3605_s5 + $0x4] sm:$0xf] }
 0x272   :  { %1307 = vperm.xlu0 %2751, %v1298_v46   ;;  %v1300_v49 = vmul.f32 %v1298_v46, %v1282_v14 }
 0x274   :  { %v1301_v50 = vsub.f32 %v1299_v48, %v1300_v49 }
 0x276   :  { %1315 = vperm.xlu1 %2752, %v1301_v50  }
 0x2e4   :  { %v1308_v51 = vpop.permute.xlu0 %1307 }
 0x2e5   :  { %v1312_v52 = vmul.f32 %v1308_v51, %v3149_v31  ;;  %v1310_v53 = vmul.f32 %v1308_v51, %v3151_v32  ;;  %v1311_v55 = vmul.f32 %v1308_v51, %v3153_v37  ;;  %v1940_v12 = vmul.f32 %v1308_v51, %v3172_v5 }
 0x2e6   :  { %v1938_v5 = vmul.f32 %v1308_v51, %v3166_v63  ;;  %v1939_v20 = vmul.f32 %v1308_v51, %v3170_v3 }
 0x2e8   :  { %v1316_v56 = vpop.permute.xlu1 %1315 }
 0x2e9   :  { %v1320_v44 = vadd.f32 %v1316_v56, %v1312_v52  ;;  %v1318_v47 = vadd.f32 %v1316_v56, %v1310_v53  ;;  %v1319_v57 = vadd.f32 %v1316_v56, %v1311_v55  ;;  %v1943_v16 = vadd.f32 %v1940_v12, %v1316_v56 }
 0x2ea   :  { %v1941_v22 = vadd.f32 %v1938_v5, %v1316_v56  ;;  %v1942_v21 = vadd.f32 %v1939_v20, %v1316_v56 }
 0x2eb   :  { %v1323_v58 = vmax.f32 %v1320_v44, 0.0  ;;  %v1321_v59 = vmax.f32 %v1318_v47, 0.0  ;;  %v1322_v60 = vmax.f32 %v1319_v57, 0.0  ;;  %v1946_v34 = vmax.f32 %v1943_v16, 0.0 }
 0x2ec   :  { %v1944_v23 = vmax.f32 %v1941_v22, 0.0  ;;  %v1945_v14 = vmax.f32 %v1942_v21, 0.0 }
 0x2ed   :  { %v1326_v61 = vmul.f32 %v1323_v58, %v3145_v26  ;;  %v1324_v0 = vmul.f32 %v1321_v59, %v3143_v19  ;;  %v1325_v1 = vmul.f32 %v1322_v60, %v3147_v30  ;;  %v1949_v18 = vmul.f32 %v1946_v34, %v3145_v26  ;;  %v2675_v59 = vld [vmem:[%s3605_s5 + $0x8] sm:$0xf] }
 0x2ee   :  { %v1947_v24 = vmul.f32 %v1944_v23, %v3143_v19  ;;  %v1948_v27 = vmul.f32 %v1945_v14, %v3147_v30 }
 0x2ef   :  { %v1328_v42 = vpack.c.bf16 %v1326_v61, %v1326_v61  ;;  %v1327_v62 = vpack.c.bf16 %v1325_v1, %v1324_v0  ;;  %v1951_v33 = vpack.c.bf16 %v1949_v18, %v1949_v18  ;;  %v2683_v18 = vld [vmem:[%s3605_s5 + $0x10] sm:$0xf] }
 0x2f0   :  { %v1950_v63 = vpack.c.bf16 %v1948_v27, %v1947_v24  ;;  %v2687_v24 = vld [vmem:[%s3605_s5 + $0x14] sm:$0xf] }
 0x2f1   :  { %1333 = vrot.lane.b32.xlu1 %v1328_v42, %s2766_s3  ;;  %1331 = vrot.lane.b32.xlu2 %v1327_v62, %s2766_s3 }
 0x34b   :  { %v1332_v31 = vpop.permute.xlu2 %1331 }
 0x34c   :  { %v1335_v37 = vrot.slane %v1332_v31, 4 }
 0x34e   :  { %v1337_v2 = vsel %vm1336_vm1, %v1335_v37, %v1332_v31  ;;  %v2679_v31 = vld [vmem:[%s3605_s5 + $0xc] sm:$0xf] }
 0x34f   :  { %1344 = vst.msk [vmem:[#allocation2] sm:$0xff] %vm3197_vm11, %v1337_v2 }
 0x356   :  { %v1347_v4 = vld [vmem:[#allocation2] sm:$0xff] }
 0x357   :  { %v1354_v6 = vunpack.c.l.b16 %v1347_v4  ;;  %v1355_v8 = vunpack.c.h.b16 %v1347_v4 }
 0x359   :  { %v1357_v9 = vpack.c.b16 %v1354_v6, %v1354_v6  ;;  %v3204_v11 = vpack.c.b16 %v1355_v8, %v1355_v8 }
 0x35b   :  { %1362 = vrot.lane.b32.xlu1 %v3204_v11, %s2757_s29  ;;  %1360 = vrot.lane.b32.xlu2 %v1357_v9, %s2757_s29  ;;  %v1425_v36 = vsel %vm1372_vm12, %v1357_v9, 0  ;;  %v1428_v41 = vsel %vm1372_vm12, %v3204_v11, 0 }
 0x35c   :  { %1440 = vmatpush.bf16.msra.mxu1 %v1425_v36 }
 0x35f   :  { %2672 = vmatmul.msk.bf16.vlgmr.msra.gmra.mxu1 %vm1368_vm14, %v1349_v28 }
 0x363   :  { %v1334_v10 = vpop.permute.xlu1 %1333  ;;  %1538 = vrot.lane.b32.xlu1 %v1357_v9, %s2759_s9 }
 0x364   :  { %v1338_v54 = vsel %vm1336_vm1, %v1335_v37, %v1334_v10 }
 0x365   :  { %1346 = vst.msk [vmem:[#allocation2 + $0x8] sm:$0xf] %vm1345_vm13, %v1338_v54 }
 0x36b   :  { %1476 = vrot.lane.b32.xlu1 %v3204_v11, %s2758_s30 }
 0x36c   :  { %v1348_v13 = vld [vmem:[#allocation2 + $0x8] sm:$0xf] }
 0x36d   :  { %v1356_v15 = vunpack.c.l.b16 %v1348_v13 }
 0x36f   :  { %v1359_v17 = vpack.c.b16 %v1356_v15, %v1356_v15 }
 0x371   :  { %1478 = vrot.lane.b32.xlu0 %v1359_v17, %s2758_s30  ;;  %1364 = vrot.lane.b32.xlu2 %v1359_v17, %s2757_s29  ;;  %v1431_v43 = vsel %vm1372_vm12, %v1359_v17, 0 }
 0x373   :  { %1606 = vrot.lane.b32.xlu1 %v1359_v17, %s2760_s10 }
 0x379   :  { %1474 = vrot.lane.b32.xlu0 %v1357_v9, %s2758_s30  ;;  %1540 = vrot.lane.b32.xlu2 %v3204_v11, %s2759_s9 }
 0x37b   :  { %1956 = vrot.lane.b32.xlu1 %v1951_v33, %s2766_s3 }
 0x381   :  { %1604 = vrot.lane.b32.xlu0 %v3204_v11, %s2760_s10  ;;  %1602 = vrot.lane.b32.xlu2 %v1357_v9, %s2760_s10 }
 0x383   :  { %1666 = vrot.lane.b32.xlu1 %v1357_v9, %s2761_s11 }
 0x389   :  { %1542 = vrot.lane.b32.xlu2 %v1359_v17, %s2759_s9  ;;  %1954 = vrot.lane.b32.xlu0 %v1950_v63, %s2766_s3 }
 0x38b   :  { %1796 = vrot.lane.b32.xlu1 %v3204_v11, %s2763_s13 }
 0x391   :  { %1668 = vrot.lane.b32.xlu2 %v3204_v11, %s2761_s11  ;;  %1670 = vrot.lane.b32.xlu0 %v1359_v17, %s2761_s11 }
 0x393   :  { %1858 = vrot.lane.b32.xlu1 %v1357_v9, %s2764_s16 }
 0x399   :  { %1734 = vrot.lane.b32.xlu2 %v1359_v17, %s2762_s12  ;;  %1794 = vrot.lane.b32.xlu0 %v1357_v9, %s2763_s13 }
 0x39b   :  { %1798 = vrot.lane.b32.xlu1 %v1359_v17, %s2763_s13 }
 0x3a1   :  { %1730 = vrot.lane.b32.xlu2 %v1357_v9, %s2762_s12  ;;  %1732 = vrot.lane.b32.xlu0 %v3204_v11, %s2762_s12 }
 0x3a9   :  { %1860 = vrot.lane.b32.xlu2 %v3204_v11, %s2764_s16  ;;  %1862 = vrot.lane.b32.xlu0 %v1359_v17, %s2764_s16 }
 0x3b5   :  { %v1361_v3 = vpop.permute.xlu2 %1360 }
 0x3cb   :  { %v1365_v29 = vpop.permute.xlu2 %1364 }
 0x3cc   :  { %v1380_v7 = vsel %vm1372_vm12, %v1365_v29, 0 }
 0x3cd   :  { %v1363_v38 = vpop.permute.xlu1 %1362  ;;  %1415 = vmatpush.bf16.msra.mxu0 %v1380_v7 }
 0x3ce   :  { %v1366_v35 = vsel %vm49_vm3, %v1361_v3, %v1363_v38  ;;  %v1367_v39 = vsel %vm49_vm3, %v1363_v38, %v1365_v29 }
 0x3cf   :  { %v1374_v25 = vsel %vm1372_vm12, %v1366_v35, 0  ;;  %v1377_v40 = vsel %vm1372_vm12, %v1367_v39, 0 }
 0x3d0   :  { %1389 = vmatpush.bf16.msrb.mxu2 %v1374_v25  ;;  %1402 = vmatpush.bf16.msrb.mxu3 %v1377_v40 }
 0x3d1   :  { %2671 = vmatmul.msk.bf16.vlgmr.msra.gmra.mxu0 %vm1368_vm14, %v2668_v45 }
 0x3d3   :  { %2669 = vmatmul.msk.bf16.vlgmr.msrb.gmra.mxu2 %vm1368_vm14, %v2668_v45  ;;  %2670 = vmatmul.msk.bf16.vlgmr.msrb.gmra.mxu3 %vm1368_vm14, %v2668_v45  ;;  %v1541_v46 = vpop.permute.xlu2 %1540 }
 0x3d4   :  { %1453 = vmatpush.bf16.msra.mxu2 %v1428_v41  ;;  %1466 = vmatpush.bf16.msra.mxu3 %v1431_v43 }
 0x3d5   :  { %v1539_v48 = vpop.permute.xlu1 %1538 }
 0x3d6   :  { %v1544_v49 = vsel %vm244_vm4, %v1539_v48, %v1541_v46 }
 0x3d7   :  { %v1550_v50 = vsel %vm1372_vm12, %v1544_v49, 0 }
 0x3d8   :  { %1565 = vmatpush.bf16.msrb.mxu3 %v1550_v50 }
 0x3db   :  { %v1603_v51 = vpop.permute.xlu2 %1602 }
 0x3dd   :  { %v1477_v52 = vpop.permute.xlu1 %1476 }
 0x3e3   :  { %v1479_v53 = vpop.permute.xlu0 %1478  ;;  %2673 = vmatmul.msk.bf16.vlgmr.msra.gmra.mxu2 %vm1368_vm14, %v1349_v28  ;;  %2674 = vmatmul.msk.bf16.vlgmr.msra.gmra.mxu3 %vm1368_vm14, %v1349_v28  ;;  %v1543_v55 = vpop.permute.xlu2 %1542 }
 0x3e4   :  { %v1481_v56 = vsel %vm172_vm2, %v1477_v52, %v1479_v53  ;;  %v1492_v44 = vsel %vm1372_vm12, %v1479_v53, 0  ;;  %v1556_v58 = vsel %vm1372_vm12, %v1543_v55, 0  ;;  %v1545_v60 = vsel %vm244_vm4, %v1541_v46, %v1543_v55 }
 0x3e5   :  { %v1489_v47 = vsel %vm1372_vm12, %v1481_v56, 0  ;;  %v1607_v57 = vpop.permute.xlu1 %1606  ;;  %1527 = vmatpush.bf16.msrb.mxu2 %v1492_v44  ;;  %v1553_v62 = vsel %vm1372_vm12, %v1545_v60, 0  ;;  %v2691_v56 = vld [vmem:[%s3605_s5 + $0x18] sm:$0xf] }
 0x3e6   :  { %1514 = vmatpush.bf16.msrb.mxu1 %v1489_v47  ;;  %v1620_v37 = vsel %vm1372_vm12, %v1607_v57, 0 }
 0x3e9   :  { %2677 = vmatmul.msk.bf16.vlgmr.msrb.gmra.mxu1 %vm1368_vm14, %v2675_v59 }
 0x3ea   :  { %1591 = vmatpush.bf16.msra.mxu1 %v1556_v58 }
 0x3eb   :  { %v1475_v61 = vpop.permute.xlu0 %1474  ;;  %v1669_v2 = vpop.permute.xlu2 %1668 }
 0x3ec   :  { %v1480_v0 = vsel %vm172_vm2, %v1475_v61, %v1477_v52  ;;  %v2699_v61 = vld [vmem:[%s3605_s5 + $0x20] sm:$0xf] }
 0x3ed   :  { %v1486_v1 = vsel %vm1372_vm12, %v1480_v0, 0  ;;  %v1957_v42 = vpop.permute.xlu1 %1956  ;;  %v1442_v0 = vpop.f32.mrf.mxu1 }
 0x3ee   :  { %1501 = vmatpush.bf16.msrb.mxu0 %v1486_v1 }
 0x3f1   :  { %2676 = vmatmul.msk.bf16.vlgmr.msrb.gmra.mxu0 %vm1368_vm14, %v2675_v59 }
 0x3f2   :  { %1578 = vmatpush.bf16.msra.mxu0 %v1553_v62 }
 0x3f3   :  { %v1605_v4 = vpop.permute.xlu0 %1604  ;;  %2678 = vmatmul.msk.bf16.vlgmr.msrb.gmra.mxu2 %vm1368_vm14, %v2675_v59  ;;  %2680 = vmatmul.msk.bf16.vlgmr.msrb.gmra.mxu3 %vm1368_vm14, %v2679_v31  ;;  %v1735_v13 = vpop.permute.xlu2 %1734  ;;  %v2695_v59 = vld [vmem:[%s3605_s5 + $0x1c] sm:$0xf] }
 0x3f4   :  { %v1608_v6 = vsel %vm316_vm5, %v1603_v51, %v1605_v4  ;;  %v1609_v8 = vsel %vm316_vm5, %v1605_v4, %v1607_v57  ;;  %v1748_v22 = vsel %vm1372_vm12, %v1735_v13, 0 }
 0x3f5   :  { %v1614_v9 = vsel %vm1372_vm12, %v1608_v6, 0  ;;  %v1617_v11 = vsel %vm1372_vm12, %v1609_v8, 0  ;;  %v1667_v36 = vpop.permute.xlu1 %1666  ;;  %v1444_v1 = vpop.f32.mrf.mxu1  ;;  %v3410_v8 = vld [vmem:[%s3605_s5] sm:$0xf] }
 0x3f6   :  { %1655 = vmatpush.bf16.msrb.mxu0 %v1620_v37  ;;  %v1672_v10 = vsel %vm388_vm6, %v1667_v36, %v1669_v2  ;;  %1629 = vmatpush.bf16.msra.mxu2 %v1614_v9 }
 0x3f7   :  { %1642 = vmatpush.bf16.msra.mxu3 %v1617_v11  ;;  %v1678_v54 = vsel %vm1372_vm12, %v1672_v10, 0 }
 0x3f8   :  { %1693 = vmatpush.bf16.msrb.mxu1 %v1678_v54 }
 0x3f9   :  { %2682 = vmatmul.msk.bf16.vlgmr.msra.gmra.mxu1 %vm1368_vm14, %v2679_v31 }
 0x3fb   :  { %v1955_v12 = vpop.permute.xlu0 %1954  ;;  %v1731_v21 = vpop.permute.xlu2 %1730 }
 0x3fc   :  { %v1958_v15 = vrot.slane %v1955_v12, 4 }
 0x3fd   :  { %v1797_v16 = vpop.permute.xlu1 %1796 }
 0x3fe   :  { %v1959_v17 = vsel %vm1336_vm1, %v1958_v15, %v1955_v12  ;;  %v1960_v34 = vsel %vm1336_vm1, %v1958_v15, %v1957_v42 }
 0x3ff   :  { %1963 = vst.msk [vmem:[#allocation2] sm:$0xff] %vm3197_vm11, %v1959_v17 }
 0x400   :  { %1964 = vst.msk [vmem:[#allocation2 + $0x8] sm:$0xf] %vm1345_vm13, %v1960_v34 }
 0x401   :  { %2681 = vmatmul.msk.bf16.vlgmr.msra.gmra.mxu0 %vm1368_vm14, %v2679_v31 }
 0x403   :  { %2684 = vmatmul.msk.bf16.vlgmr.msra.gmra.mxu2 %vm1368_vm14, %v2683_v18  ;;  %2685 = vmatmul.msk.bf16.vlgmr.msra.gmra.mxu3 %vm1368_vm14, %v2683_v18  ;;  %v1671_v33 = vpop.permute.xlu0 %1670  ;;  %v1861_v40 = vpop.permute.xlu2 %1860 }
 0x404   :  { %v1673_v5 = vsel %vm388_vm6, %v1669_v2, %v1671_v33  ;;  %v1684_v20 = vsel %vm1372_vm12, %v1671_v33, 0 }
 0x405   :  { %v1681_v32 = vsel %vm1372_vm12, %v1673_v5, 0  ;;  %1719 = vmatpush.bf16.msrb.mxu3 %v1684_v20  ;;  %v1859_v14 = vpop.permute.xlu1 %1858 }
 0x406   :  { %v1965_v23 = vld [vmem:[#allocation2] sm:$0xff]  ;;  %1706 = vmatpush.bf16.msrb.mxu2 %v1681_v32  ;;  %v1864_v43 = vsel %vm604_vm9, %v1859_v14, %v1861_v40 }
 0x407   :  { %v1971_v27 = vunpack.c.l.b16 %v1965_v23  ;;  %v1972_v63 = vunpack.c.h.b16 %v1965_v23  ;;  %v1966_v3 = vld [vmem:[#allocation2 + $0x8] sm:$0xf]  ;;  %v1870_v48 = vsel %vm1372_vm12, %v1864_v43, 0 }
 0x408   :  { %v1973_v28 = vunpack.c.l.b16 %v1966_v3 }
 0x409   :  { %v3315_v29 = vpack.c.b16 %v1971_v27, %v1971_v27  ;;  %v3317_v7 = vpack.c.b16 %v1972_v63, %v1972_v63  ;;  %2688 = vmatmul.msk.bf16.vlgmr.msrb.gmra.mxu1 %vm1368_vm14, %v2687_v24 }
 0x40a   :  { %1783 = vmatpush.bf16.msra.mxu2 %v1748_v22  ;;  %v3320_v38 = vpack.c.b16 %v1973_v28, %v1973_v28 }
 0x40b   :  { %1979 = vrot.lane.b32.xlu2 %v3317_v7, %s2757_s29  ;;  %1977 = vrot.lane.b32.xlu1 %v3315_v29, %s2757_s29  ;;  %v1795_v35 = vpop.permute.xlu0 %1794  ;;  %v2040_v60 = vsel %vm1372_vm12, %v3315_v29, 0 }
 0x40c   :  { %1981 = vrot.lane.b32.xlu0 %v3320_v38, %s2757_s29  ;;  %v1800_v39 = vsel %vm532_vm8, %v1795_v35, %v1797_v16 }
 0x40d   :  { %v1806_v25 = vsel %vm1372_vm12, %v1800_v39, 0  ;;  %v1799_v41 = vpop.permute.xlu1 %1798  ;;  %v2043_v39 = vsel %vm1372_vm12, %v3317_v7, 0 }
 0x40e   :  { %1821 = vmatpush.bf16.msra.mxu3 %v1806_v25  ;;  %v1801_v45 = vsel %vm532_vm8, %v1797_v16, %v1799_v41  ;;  %v1812_v55 = vsel %vm1372_vm12, %v1799_v41, 0  ;;  %v2703_v25 = vld [vmem:[%s3605_s5 + $0x4] sm:$0xf]  ;;  %v2046_v41 = vsel %vm1372_vm12, %v3320_v38, 0 }
 0x40f   :  { %v1809_v53 = vsel %vm1372_vm12, %v1801_v45, 0 }
 0x411   :  { %2686 = vmatmul.msk.bf16.vlgmr.msrb.gmra.mxu0 %vm1368_vm14, %v2683_v18 }
 0x413   :  { %2088 = vrot.lane.b32.xlu2 %v3315_v29, %s2758_s30  ;;  %2151 = vrot.lane.b32.xlu1 %v3315_v29, %s2759_s9  ;;  %v1733_v46 = vpop.permute.xlu0 %1732 }
 0x414   :  { %2090 = vrot.lane.b32.xlu0 %v3317_v7, %s2758_s30  ;;  %2689 = vmatmul.msk.bf16.vlgmr.msrb.gmra.mxu2 %vm1368_vm14, %v2687_v24  ;;  %v1736_v49 = vsel %vm460_vm7, %v1731_v21, %v1733_v46  ;;  %v1737_v50 = vsel %vm460_vm7, %v1733_v46, %v1735_v13 }
 0x415   :  { %2690 = vmatmul.msk.bf16.vlgmr.msrb.gmra.mxu3 %vm1368_vm14, %v2687_v24  ;;  %1885 = vmatpush.bf16.msrb.mxu2 %v1870_v48  ;;  %v1742_v51 = vsel %vm1372_vm12, %v1736_v49, 0  ;;  %v1745_v52 = vsel %vm1372_vm12, %v1737_v50, 0 }
 0x416   :  { %1757 = vmatpush.bf16.msra.mxu0 %v1742_v51  ;;  %1770 = vmatpush.bf16.msra.mxu1 %v1745_v52 }
 0x419   :  { %2693 = vmatmul.msk.bf16.vlgmr.msra.gmra.mxu1 %vm1368_vm14, %v2691_v56 }
 0x41a   :  { %1834 = vmatpush.bf16.msrb.mxu0 %v1809_v53  ;;  %1847 = vmatpush.bf16.msrb.mxu1 %v1812_v55 }
 0x41b   :  { %2153 = vrot.lane.b32.xlu2 %v3317_v7, %s2759_s9  ;;  %2092 = vrot.lane.b32.xlu1 %v3320_v38, %s2758_s30  ;;  %v1863_v44 = vpop.permute.xlu0 %1862 }
 0x41c   :  { %2155 = vrot.lane.b32.xlu0 %v3320_v38, %s2759_s9  ;;  %v1865_v47 = vsel %vm604_vm9, %v1861_v40, %v1863_v44  ;;  %v1876_v58 = vsel %vm1372_vm12, %v1863_v44, 0 }
 0x41d   :  { %v1873_v57 = vsel %vm1372_vm12, %v1865_v47, 0 }
 0x41e   :  { %1898 = vmatpush.bf16.msrb.mxu3 %v1873_v57 }
 0x421   :  { %2692 = vmatmul.msk.bf16.vlgmr.msra.gmra.mxu0 %vm1368_vm14, %v2691_v56 }
 0x422   :  { %1911 = vmatpush.bf16.msra.mxu0 %v1876_v58 }
 0x423   :  { %2216 = vrot.lane.b32.xlu2 %v3317_v7, %s2760_s10  ;;  %2214 = vrot.lane.b32.xlu1 %v3315_v29, %s2760_s10 }
 0x424   :  { %2218 = vrot.lane.b32.xlu0 %v3320_v38, %s2760_s10  ;;  %2694 = vmatmul.msk.bf16.vlgmr.msra.gmra.mxu2 %vm1368_vm14, %v2691_v56 }
 0x425   :  { %2696 = vmatmul.msk.bf16.vlgmr.msra.gmra.mxu3 %vm1368_vm14, %v2695_v59 }
 0x429   :  { %2698 = vmatmul.msk.bf16.vlgmr.msrb.gmra.mxu1 %vm1368_vm14, %v2695_v59 }
 0x42b   :  { %2281 = vrot.lane.b32.xlu2 %v3320_v38, %s2761_s11  ;;  %2342 = vrot.lane.b32.xlu1 %v3317_v7, %s2762_s12 }
 0x42c   :  { %2340 = vrot.lane.b32.xlu0 %v3315_v29, %s2762_s12 }
 0x431   :  { %2697 = vmatmul.msk.bf16.vlgmr.msrb.gmra.mxu0 %vm1368_vm14, %v2695_v59 }
 0x432   :  { %2055 = vmatpush.bf16.msrb.mxu0 %v2040_v60 }
 0x433   :  { %2277 = vrot.lane.b32.xlu2 %v3315_v29, %s2761_s11  ;;  %2403 = vrot.lane.b32.xlu1 %v3315_v29, %s2763_s13 }
 0x434   :  { %2279 = vrot.lane.b32.xlu0 %v3317_v7, %s2761_s11  ;;  %2700 = vmatmul.msk.bf16.vlgmr.msrb.gmra.mxu2 %vm1368_vm14, %v2699_v61 }
 0x435   :  { %2701 = vmatmul.msk.bf16.vlgmr.msrb.gmra.mxu3 %vm1368_vm14, %v2699_v61 }
 0x43b   :  { %2405 = vrot.lane.b32.xlu2 %v3317_v7, %s2763_s13  ;;  %2344 = vrot.lane.b32.xlu1 %v3320_v38, %s2762_s12 }
 0x43c   :  { %2407 = vrot.lane.b32.xlu0 %v3320_v38, %s2763_s13 }
 0x441   :  { %2702 = vmatmul.msk.bf16.vlgmr.msra.gmra.mxu0 %vm1368_vm14, %v2699_v61 }
 0x443   :  { %2468 = vrot.lane.b32.xlu2 %v3317_v7, %s2764_s16  ;;  %2466 = vrot.lane.b32.xlu1 %v3315_v29, %s2764_s16 }
 0x444   :  { %2470 = vrot.lane.b32.xlu0 %v3320_v38, %s2764_s16 }
 0x44e   :  { %v1417_v42 = vpop.f32.mrf.mxu0 }
 0x451   :  { %2707 = vmatmul.msk.bf16.vlgmr.msrb.gmra.mxu0 %vm1368_vm14, %v3410_v8 }
 0x456   :  { %v1391_v62 = vpop.f32.mrf.mxu2  ;;  %v1404_v31 = vpop.f32.mrf.mxu3 }
 0x457   :  { %v1419_v37 = vpop.f32.mrf.mxu0  ;;  %v1443_v2 = vadd.f32 %v1442_v0, %v1391_v62  ;;  %v2710_v62 = vld [vmem:[%s3605_s5 + $0x8] sm:$0xf] }
 0x45e   :  { %v1393_v4 = vpop.f32.mrf.mxu2  ;;  %v1406_v6 = vpop.f32.mrf.mxu3 }
 0x465   :  { %v1980_v18 = vpop.permute.xlu2 %1979 }
 0x466   :  { %v1455_v9 = vpop.f32.mrf.mxu2  ;;  %v1468_v11 = vpop.f32.mrf.mxu3 }
 0x467   :  { %v1456_v36 = vadd.f32 %v1455_v9, %v1404_v31  ;;  %v3414_v10 = vadd.f32 %v1468_v11, %v1417_v42  ;;  %v1516_v54 = vpop.f32.mrf.mxu1 }
 0x469   :  { %v3416_v12 = vadd.f32 %v1516_v54, %v1456_v36 }
 0x46d   :  { %v2089_v22 = vpop.permute.xlu2 %2088 }
 0x46e   :  { %v1457_v13 = vpop.f32.mrf.mxu2  ;;  %v1470_v15 = vpop.f32.mrf.mxu3 }
 0x46f   :  { %v1503_v16 = vpop.f32.mrf.mxu0  ;;  %v1518_v17 = vpop.f32.mrf.mxu1 }
 0x470   :  { %v3418_v34 = vadd.f32 %v1503_v16, %v1443_v2 }
 0x475   :  { %v2154_v43 = vpop.permute.xlu2 %2153 }
 0x476   :  { %v3420_v33 = vpop.f32.mrf.mxu2  ;;  %v3422_v5 = vpop.f32.mrf.mxu3 }
 0x477   :  { %v1505_v20 = vpop.f32.mrf.mxu0  ;;  %v3424_v32 = vpop.f32.mrf.mxu1 }
 0x47d   :  { %v1978_v21 = vpop.permute.xlu1 %1977  ;;  %v2217_v0 = vpop.permute.xlu2 %2216 }
 0x47e   :  { %v1983_v23 = vsel %vm49_vm3, %v1978_v21, %v1980_v18  ;;  %v1982_v14 = vpop.permute.xlu0 %1981  ;;  %v1531_v24 = vpop.f32.mrf.mxu2 }
 0x47f   :  { %v1989_v27 = vsel %vm1372_vm12, %v1983_v23, 0  ;;  %v1984_v63 = vsel %vm49_vm3, %v1980_v18, %v1982_v14  ;;  %v1995_v3 = vsel %vm1372_vm12, %v1982_v14, 0  ;;  %v1569_v28 = vpop.f32.mrf.mxu3  ;;  %v3430_v29 = vpop.f32.mrf.mxu0  ;;  %v2714_v14 = vld [vmem:[%s3605_s5 + $0xc] sm:$0xf] }
 0x480   :  { %v1992_v35 = vsel %vm1372_vm12, %v1984_v63, 0  ;;  %2030 = vmatpush.bf16.msra.mxu3 %v1995_v3  ;;  %2004 = vmatpush.bf16.msra.mxu1 %v1989_v27  ;;  %v1595_v40 = vpop.f32.mrf.mxu1 }
 0x481   :  { %2017 = vmatpush.bf16.msra.mxu2 %v1992_v35 }
 0x483   :  { %2706 = vmatmul.msk.bf16.vlgmr.msra.gmra.mxu3 %vm1368_vm14, %v2703_v25  ;;  %2704 = vmatmul.msk.bf16.vlgmr.msra.gmra.mxu1 %vm1368_vm14, %v2703_v25 }
 0x484   :  { %2068 = vmatpush.bf16.msrb.mxu1 %v2043_v39  ;;  %2705 = vmatmul.msk.bf16.vlgmr.msra.gmra.mxu2 %vm1368_vm14, %v2703_v25 }
 0x485   :  { %2081 = vmatpush.bf16.msrb.mxu2 %v2046_v41  ;;  %v2152_v45 = vpop.permute.xlu1 %2151  ;;  %v2282_v16 = vpop.permute.xlu2 %2281 }
 0x486   :  { %v2157_v7 = vsel %vm244_vm4, %v2152_v45, %v2154_v43  ;;  %v2091_v46 = vpop.permute.xlu0 %2090  ;;  %v3444_v48 = vpop.f32.mrf.mxu2  ;;  %v2295_v63 = vsel %vm1372_vm12, %v2282_v16, 0 }
 0x487   :  { %v2163_v49 = vsel %vm1372_vm12, %v2157_v7, 0  ;;  %v2094_v50 = vsel %vm172_vm2, %v2089_v22, %v2091_v46  ;;  %v1582_v51 = vpop.f32.mrf.mxu0  ;;  %v3448_v38 = vpop.f32.mrf.mxu3 }
 0x488   :  { %v2100_v52 = vsel %vm1372_vm12, %v2094_v50, 0  ;;  %v3451_v53 = vpop.f32.mrf.mxu1  ;;  %v1598_v50 = vadd.f32 %v3430_v29, %v3416_v12  ;;  %v1535_v51 = vadd.f32 %v3420_v33, %v3414_v10  ;;  %v2718_v10 = vld [vmem:[%s3605_s5 + $0x10] sm:$0xf] }
 0x489   :  { %2178 = vmatpush.bf16.msra.mxu2 %v2163_v49  ;;  %2115 = vmatpush.bf16.msrb.mxu3 %v2100_v52  ;;  %v1597_v49 = vadd.f32 %v3422_v5, %v3418_v34 }
 0x48b   :  { %v1661_v52 = vadd.f32 %v3444_v48, %v1597_v49 }
 0x48d   :  { %v2093_v55 = vpop.permute.xlu1 %2092  ;;  %v2278_v3 = vpop.permute.xlu2 %2277 }
 0x48e   :  { %v2095_v56 = vsel %vm172_vm2, %v2091_v46, %v2093_v55  ;;  %v2106_v44 = vsel %vm1372_vm12, %v2093_v55, 0  ;;  %v2156_v47 = vpop.permute.xlu0 %2155  ;;  %v1633_v57 = vpop.f32.mrf.mxu2  ;;  %v1662_v55 = vadd.f32 %v3448_v38, %v1598_v50 }
 0x48f   :  { %v2103_v58 = vsel %vm1372_vm12, %v2095_v56, 0  ;;  %v2158_v59 = vsel %vm244_vm4, %v2154_v43, %v2156_v47  ;;  %v1646_v60 = vpop.f32.mrf.mxu3  ;;  %v3457_v61 = vpop.f32.mrf.mxu0  ;;  %2141 = vmatpush.bf16.msra.mxu1 %v2106_v44  ;;  %v2169_v42 = vsel %vm1372_vm12, %v2156_v47, 0  ;;  %v1599_v44 = vadd.f32 %v3424_v32, %v1535_v51 }
 0x490   :  { %v2166_v1 = vsel %vm1372_vm12, %v2158_v59, 0  ;;  %2128 = vmatpush.bf16.msra.mxu0 %v2103_v58  ;;  %v1697_v31 = vpop.f32.mrf.mxu1  ;;  %v1725_v32 = vadd.f32 %v3451_v53, %v1661_v52  ;;  %v2730_v52 = vld [vmem:[%s3605_s5 + $0x1c] sm:$0xf] }
 0x491   :  { %2191 = vmatpush.bf16.msra.mxu3 %v2166_v1  ;;  %v1663_v38 = vadd.f32 %v3457_v61, %v1599_v44 }
 0x493   :  { %2711 = vmatmul.msk.bf16.vlgmr.msrb.gmra.mxu3 %vm1368_vm14, %v2710_v62  ;;  %2708 = vmatmul.msk.bf16.vlgmr.msrb.gmra.mxu1 %vm1368_vm14, %v3410_v8 }
 0x494   :  { %2204 = vmatpush.bf16.msrb.mxu0 %v2169_v42  ;;  %2709 = vmatmul.msk.bf16.vlgmr.msrb.gmra.mxu2 %vm1368_vm14, %v3410_v8 }
 0x495   :  { %2712 = vmatmul.msk.bf16.vlgmr.msra.gmra.mxu0 %vm1368_vm14, %v2710_v62  ;;  %v2215_v37 = vpop.permute.xlu1 %2214  ;;  %v2406_v47 = vpop.permute.xlu2 %2405 }
 0x496   :  { %v2220_v2 = vsel %vm316_vm5, %v2215_v37, %v2217_v0  ;;  %v2219_v4 = vpop.permute.xlu0 %2218 }
 0x497   :  { %v2226_v6 = vsel %vm1372_vm12, %v2220_v2, 0  ;;  %v2221_v9 = vsel %vm316_vm5, %v2217_v0, %v2219_v4  ;;  %v2232_v11 = vsel %vm1372_vm12, %v2219_v4, 0  ;;  %v1659_v36 = vpop.f32.mrf.mxu0  ;;  %v1708_v54 = vpop.f32.mrf.mxu2  ;;  %v2722_v0 = vld [vmem:[%s3605_s5 + $0x14] sm:$0xf] }
 0x498   :  { %v2229_v13 = vsel %vm1372_vm12, %v2221_v9, 0  ;;  %v3475_v15 = vpop.f32.mrf.mxu3  ;;  %2267 = vmatpush.bf16.msrb.mxu3 %v2232_v11  ;;  %2241 = vmatpush.bf16.msrb.mxu1 %v2226_v6  ;;  %v3477_v8 = vpop.f32.mrf.mxu1  ;;  %v1726_v48 = vadd.f32 %v1708_v54, %v1662_v55  ;;  %v2734_v55 = vld [vmem:[%s3605_s5 + $0x20] sm:$0xf] }
 0x499   :  { %2254 = vmatpush.bf16.msrb.mxu2 %v2229_v13  ;;  %v1727_v37 = vadd.f32 %v3475_v15, %v1663_v38 }
 0x49d   :  { %v2343_v17 = vpop.permute.xlu1 %2342 }
 0x49e   :  { %v2341_v18 = vpop.permute.xlu0 %2340 }
 0x49f   :  { %v1710_v20 = vpop.f32.mrf.mxu2  ;;  %v1759_v22 = vpop.f32.mrf.mxu0  ;;  %v2346_v21 = vsel %vm460_vm7, %v2341_v18, %v2343_v17 }
 0x4a0   :  { %v1723_v23 = vpop.f32.mrf.mxu3  ;;  %v1774_v24 = vpop.f32.mrf.mxu1  ;;  %v2352_v27 = vsel %vm1372_vm12, %v2346_v21, 0  ;;  %v1789_v53 = vadd.f32 %v1759_v22, %v1725_v32 }
 0x4a1   :  { %v2469_v21 = vpop.permute.xlu2 %2468 }
 0x4a3   :  { %2716 = vmatmul.msk.bf16.vlgmr.msra.gmra.mxu3 %vm1368_vm14, %v2714_v14  ;;  %2713 = vmatmul.msk.bf16.vlgmr.msra.gmra.mxu1 %vm1368_vm14, %v2710_v62  ;;  %v1790_v62 = vadd.f32 %v3477_v8, %v1726_v48 }
 0x4a4   :  { %2367 = vmatpush.bf16.msra.mxu3 %v2352_v27  ;;  %2715 = vmatmul.msk.bf16.vlgmr.msra.gmra.mxu2 %vm1368_vm14, %v2714_v14 }
 0x4a5   :  { %2717 = vmatmul.msk.bf16.vlgmr.msrb.gmra.mxu0 %vm1368_vm14, %v2714_v14  ;;  %2330 = vmatpush.bf16.msra.mxu2 %v2295_v63  ;;  %v2404_v28 = vpop.permute.xlu1 %2403  ;;  %v2726_v14 = vld [vmem:[%s3605_s5 + $0x18] sm:$0xf] }
 0x4a6   :  { %v2280_v35 = vpop.permute.xlu0 %2279  ;;  %v2409_v60 = vsel %vm532_vm8, %v2404_v28, %v2406_v47 }
 0x4a7   :  { %v2283_v39 = vsel %vm388_vm6, %v2278_v3, %v2280_v35  ;;  %v2284_v25 = vsel %vm388_vm6, %v2280_v35, %v2282_v16  ;;  %v1761_v40 = vpop.f32.mrf.mxu0  ;;  %v1785_v41 = vpop.f32.mrf.mxu2  ;;  %v2415_v61 = vsel %vm1372_vm12, %v2409_v60, 0 }
 0x4a8   :  { %v2289_v43 = vsel %vm1372_vm12, %v2283_v39, 0  ;;  %v2292_v45 = vsel %vm1372_vm12, %v2284_v25, 0  ;;  %v1823_v7 = vpop.f32.mrf.mxu3  ;;  %v1849_v46 = vpop.f32.mrf.mxu1  ;;  %v1791_v13 = vadd.f32 %v1785_v41, %v1727_v37 }
 0x4a9   :  { %2304 = vmatpush.bf16.msra.mxu0 %v2289_v43  ;;  %2317 = vmatpush.bf16.msra.mxu1 %v2292_v45  ;;  %v1853_v2 = vadd.f32 %v1823_v7, %v1789_v53 }
 0x4aa   :  { %v1855_v18 = vadd.f32 %v1849_v46, %v1791_v13 }
 0x4ad   :  { %v2345_v56 = vpop.permute.xlu1 %2344 }
 0x4ae   :  { %v2347_v57 = vsel %vm460_vm7, %v2343_v17, %v2345_v56  ;;  %v2408_v58 = vpop.permute.xlu0 %2407  ;;  %v2358_v42 = vsel %vm1372_vm12, %v2345_v56, 0 }
 0x4af   :  { %v2355_v34 = vsel %vm1372_vm12, %v2347_v57, 0  ;;  %v1787_v5 = vpop.f32.mrf.mxu2  ;;  %v1836_v12 = vpop.f32.mrf.mxu0  ;;  %v2410_v29 = vsel %vm532_vm8, %v2406_v47, %v2408_v58  ;;  %v2421_v31 = vsel %vm1372_vm12, %v2408_v58, 0 }
 0x4b0   :  { %v1825_v59 = vpop.f32.mrf.mxu3  ;;  %2380 = vmatpush.bf16.msrb.mxu0 %v2355_v34  ;;  %v1851_v33 = vpop.f32.mrf.mxu1  ;;  %v2418_v1 = vsel %vm1372_vm12, %v2410_v29, 0  ;;  %v1854_v4 = vadd.f32 %v1836_v12, %v1790_v62 }
 0x4b3   :  { %2721 = vmatmul.msk.bf16.vlgmr.msrb.gmra.mxu3 %vm1368_vm14, %v2718_v10  ;;  %2719 = vmatmul.msk.bf16.vlgmr.msrb.gmra.mxu1 %vm1368_vm14, %v2718_v10 }
 0x4b4   :  { %2443 = vmatpush.bf16.msrb.mxu3 %v2418_v1  ;;  %2720 = vmatmul.msk.bf16.vlgmr.msrb.gmra.mxu2 %vm1368_vm14, %v2718_v10 }
 0x4b5   :  { %2723 = vmatmul.msk.bf16.vlgmr.msra.gmra.mxu0 %vm1368_vm14, %v2722_v0  ;;  %2393 = vmatpush.bf16.msrb.mxu1 %v2358_v42  ;;  %v2467_v17 = vpop.permute.xlu1 %2466 }
 0x4b6   :  { %2430 = vmatpush.bf16.msrb.mxu2 %v2415_v61  ;;  %2456 = vmatpush.bf16.msra.mxu0 %v2421_v31  ;;  %v2471_v15 = vpop.permute.xlu0 %2470  ;;  %v2472_v27 = vsel %vm604_vm9, %v2467_v17, %v2469_v21 }
 0x4b7   :  { %v1838_v6 = vpop.f32.mrf.mxu0  ;;  %v1887_v9 = vpop.f32.mrf.mxu2  ;;  %v2473_v63 = vsel %vm604_vm9, %v2469_v21, %v2471_v15  ;;  %v2484_v39 = vsel %vm1372_vm12, %v2471_v15, 0  ;;  %v2478_v40 = vsel %vm1372_vm12, %v2472_v27, 0 }
 0x4b8   :  { %v1900_v11 = vpop.f32.mrf.mxu3  ;;  %v3524_v36 = vadd.f32 %v1887_v9, %v1853_v2  ;;  %v2481_v41 = vsel %vm1372_vm12, %v2473_v63, 0 }
 0x4b9   :  { %v3526_v54 = vadd.f32 %v1900_v11, %v1854_v4 }
 0x4ba   :  { %v1920_v8 = vmul.f32 %v3524_v36, %v3143_v19 }
 0x4bb   :  { %v1921_v16 = vmul.f32 %v3526_v54, %v3147_v30 }
 0x4bc   :  { %v1929_v3 = vmul.f32 %v1920_v8, %v3524_v36 }
 0x4bd   :  { %v1930_v28 = vmul.f32 %v1921_v16, %v3526_v54  ;;  %v1923_v25 = vadd.f32 %v1921_v16, %v1920_v8 }
 0x4bf   :  { %v1913_v20 = vpop.f32.mrf.mxu0  ;;  %v1889_v22 = vpop.f32.mrf.mxu2  ;;  %v1932_v46 = vadd.f32 %v1930_v28, %v1929_v3 }
 0x4c0   :  { %v3532_v23 = vadd.f32 %v1913_v20, %v1855_v18  ;;  %v1902_v24 = vpop.f32.mrf.mxu3 }
 0x4c2   :  { %v1922_v35 = vmul.f32 %v3532_v23, %v3145_v26 }
 0x4c3   :  { %2727 = vmatmul.msk.bf16.vlgmr.msra.gmra.mxu3 %vm1368_vm14, %v2726_v14  ;;  %2724 = vmatmul.msk.bf16.vlgmr.msra.gmra.mxu1 %vm1368_vm14, %v2722_v0 }
 0x4c4   :  { %2519 = vmatpush.bf16.msra.mxu3 %v2484_v39  ;;  %2725 = vmatmul.msk.bf16.vlgmr.msra.gmra.mxu2 %vm1368_vm14, %v2722_v0  ;;  %v1924_v43 = vsel %vm672_vm10, %v1922_v35, 0.0  ;;  %v1931_v45 = vmul.f32 %v1922_v35, %v3532_v23 }
 0x4c5   :  { %2493 = vmatpush.bf16.msra.mxu1 %v2478_v40  ;;  %2506 = vmatpush.bf16.msra.mxu2 %v2481_v41  ;;  %v1925_v7 = vadd.f32 %v1924_v43, %v1923_v25 }
 0x4c6   :  { %2728 = vmatmul.msk.bf16.vlgmr.msrb.gmra.mxu0 %vm1368_vm14, %v2726_v14  ;;  %v1933_v49 = vsel %vm672_vm10, %v1931_v45, 0.0 }
 0x4c7   :  { %1926 = vadd.xlane.f32.xlu2 %v1925_v7  ;;  %v1934_v50 = vadd.f32 %v1933_v49, %v1932_v46  ;;  %v1915_v51 = vpop.f32.mrf.mxu0 }
 0x4c9   :  { %1935 = vadd.xlane.f32.xlu1 %v1934_v50 }
 0x4cf   :  { %v2057_v56 = vpop.f32.mrf.mxu0 }
 0x4d3   :  { %2732 = vmatmul.msk.bf16.vlgmr.msrb.gmra.mxu3 %vm1368_vm14, %v2730_v52  ;;  %2729 = vmatmul.msk.bf16.vlgmr.msrb.gmra.mxu1 %vm1368_vm14, %v2726_v14 }
 0x4d4   :  { %2731 = vmatmul.msk.bf16.vlgmr.msrb.gmra.mxu2 %vm1368_vm14, %v2730_v52 }
 0x4d6   :  { %2733 = vmatmul.msk.bf16.vlgmr.msra.gmra.mxu0 %vm1368_vm14, %v2730_v52 }
 0x4d7   :  { %v2059_v44 = vpop.f32.mrf.mxu0 }
 0x4e3   :  { %2737 = vmatmul.msk.bf16.vlgmr.msra.gmra.mxu3 %vm1368_vm14, %v2734_v55  ;;  %2735 = vmatmul.msk.bf16.vlgmr.msra.gmra.mxu1 %vm1368_vm14, %v2734_v55 }
 0x4e4   :  { %2736 = vmatmul.msk.bf16.vlgmr.msra.gmra.mxu2 %vm1368_vm14, %v2734_v55 }
 0x500   :  { %v2006_v47 = vpop.f32.mrf.mxu1 }
 0x501   :  { %v2058_v57 = vadd.f32 %v2057_v56, %v2006_v47 }
 0x506   :  { %v2032_v58 = vpop.f32.mrf.mxu3 }
 0x507   :  { %v2019_v34 = vpop.f32.mrf.mxu2 }
 0x508   :  { %v2008_v5 = vpop.f32.mrf.mxu1 }
 0x50e   :  { %v2034_v12 = vpop.f32.mrf.mxu3 }
 0x50f   :  { %v2021_v29 = vpop.f32.mrf.mxu2 }
 0x510   :  { %v2070_v59 = vpop.f32.mrf.mxu1 }
 0x511   :  { %v2071_v10 = vadd.f32 %v2070_v59, %v2019_v34 }
 0x512   :  { %v2130_v33 = vpop.f32.mrf.mxu0 }
 0x513   :  { %v2148_v48 = vadd.f32 %v2130_v33, %v2071_v10 }
 0x516   :  { %v2117_v32 = vpop.f32.mrf.mxu3 }
 0x517   :  { %v2147_v38 = vadd.f32 %v2117_v32, %v2058_v57  ;;  %v2083_v60 = vpop.f32.mrf.mxu2 }
 0x518   :  { %v2084_v0 = vadd.f32 %v2083_v60, %v2032_v58  ;;  %v2072_v1 = vpop.f32.mrf.mxu1 }
 0x51a   :  { %v2132_v42 = vpop.f32.mrf.mxu0 }
 0x51e   :  { %v2119_v53 = vpop.f32.mrf.mxu3 }
 0x51f   :  { %v2085_v61 = vpop.f32.mrf.mxu2 }
 0x520   :  { %v2143_v62 = vpop.f32.mrf.mxu1 }
 0x521   :  { %v2149_v41 = vadd.f32 %v2143_v62, %v2084_v0 }
 0x522   :  { %v2206_v31 = vpop.f32.mrf.mxu0 }
 0x523   :  { %v2212_v49 = vadd.f32 %v2206_v31, %v2149_v41 }
 0x526   :  { %v2193_v37 = vpop.f32.mrf.mxu3 }
 0x527   :  { %v2180_v2 = vpop.f32.mrf.mxu2  ;;  %v2211_v51 = vadd.f32 %v2193_v37, %v2148_v48 }
 0x528   :  { %v2145_v4 = vpop.f32.mrf.mxu1  ;;  %v2210_v45 = vadd.f32 %v2180_v2, %v2147_v38 }
 0x52a   :  { %v2208_v6 = vpop.f32.mrf.mxu0 }
 0x52e   :  { %v2195_v9 = vpop.f32.mrf.mxu3 }
 0x52f   :  { %v2182_v11 = vpop.f32.mrf.mxu2 }
 0x530   :  { %v2243_v13 = vpop.f32.mrf.mxu1 }
 0x531   :  { %v2273_v46 = vadd.f32 %v2243_v13, %v2210_v45 }
 0x532   :  { %v2306_v8 = vpop.f32.mrf.mxu0 }
 0x533   :  { %v2336_v55 = vadd.f32 %v2306_v8, %v2273_v46 }
 0x536   :  { %v2269_v16 = vpop.f32.mrf.mxu3 }
 0x537   :  { %v2256_v17 = vpop.f32.mrf.mxu2  ;;  %v2275_v52 = vadd.f32 %v2269_v16, %v2212_v49 }
 0x538   :  { %v2245_v15 = vpop.f32.mrf.mxu1  ;;  %v2274_v56 = vadd.f32 %v2256_v17, %v2211_v51 }
 0x53a   :  { %v2308_v18 = vpop.f32.mrf.mxu0  ;;  %v1927_v16 = vpop.xlane.xlu2 %1926 }
 0x53c   :  { %v1936_v15 = vpop.xlane.xlu1 %1935 }
 0x53e   :  { %v2271_v20 = vpop.f32.mrf.mxu3 }
 0x53f   :  { %v2258_v22 = vpop.f32.mrf.mxu2 }
 0x540   :  { %v2319_v21 = vpop.f32.mrf.mxu1 }
 0x541   :  { %v2337_v58 = vadd.f32 %v2319_v21, %v2274_v56 }
 0x543   :  { %v2382_v14 = vpop.f32.mrf.mxu0 }
 0x544   :  { %v2400_v59 = vadd.f32 %v2382_v14, %v2337_v58 }
 0x546   :  { %v2369_v24 = vpop.f32.mrf.mxu3 }
 0x547   :  { %v2332_v27 = vpop.f32.mrf.mxu2  ;;  %v2399_v34 = vadd.f32 %v2369_v24, %v2336_v55 }
 0x548   :  { %v2321_v63 = vpop.f32.mrf.mxu1  ;;  %v2338_v47 = vadd.f32 %v2332_v27, %v2275_v52 }
 0x54b   :  { %v2384_v3 = vpop.f32.mrf.mxu0 }
 0x54e   :  { %v2371_v28 = vpop.f32.mrf.mxu3 }
 0x54f   :  { %v2334_v35 = vpop.f32.mrf.mxu2 }
 0x550   :  { %v2395_v39 = vpop.f32.mrf.mxu1 }
 0x551   :  { %v2401_v12 = vadd.f32 %v2395_v39, %v2338_v47 }
 0x553   :  { %v2458_v25 = vpop.f32.mrf.mxu0 }
 0x554   :  { %v2464_v33 = vadd.f32 %v2458_v25, %v2401_v12  ;;  %v2561_v25 = vld [vmem:[%s3606_s6] sm:$0xff] }
 0x556   :  { %v2445_v40 = vpop.f32.mrf.mxu3 }
 0x557   :  { %v2432_v43 = vpop.f32.mrf.mxu2  ;;  %v2463_v32 = vadd.f32 %v2445_v40, %v2400_v59 }
 0x558   :  { %v2397_v7 = vpop.f32.mrf.mxu1  ;;  %v2462_v29 = vadd.f32 %v2432_v43, %v2399_v34  ;;  %v2563_v43 = vld [vmem:[%s3607_s7] sm:$0xff] }
 0x55b   :  { %v2460_v50 = vpop.f32.mrf.mxu0 }
 0x55e   :  { %v2447_v44 = vpop.f32.mrf.mxu3 }
 0x55f   :  { %v2434_v57 = vpop.f32.mrf.mxu2 }
 0x560   :  { %v2495_v5 = vpop.f32.mrf.mxu1 }
 0x561   :  { %v2525_v10 = vadd.f32 %v2495_v5, %v2462_v29 }
 0x563   :  { %v2528_v48 = vmul.f32 %v2525_v10, %v3143_v19 }
 0x565   :  { %v2537_v31 = vmul.f32 %v2528_v48, %v2525_v10 }
 0x566   :  { %v2521_v38 = vpop.f32.mrf.mxu3 }
 0x567   :  { %v2527_v60 = vadd.f32 %v2521_v38, %v2464_v33  ;;  %v2508_v0 = vpop.f32.mrf.mxu2 }
 0x568   :  { %v2526_v1 = vadd.f32 %v2508_v0, %v2463_v32  ;;  %v2497_v42 = vpop.f32.mrf.mxu1 }
 0x569   :  { %v2530_v53 = vmul.f32 %v2527_v60, %v3145_v26 }
 0x56a   :  { %v2529_v61 = vmul.f32 %v2526_v1, %v3147_v30 }
 0x56b   :  { %v2539_v62 = vmul.f32 %v2530_v53, %v2527_v60  ;;  %v2532_v4 = vsel %vm672_vm10, %v2530_v53, 0.0 }
 0x56c   :  { %v2538_v37 = vmul.f32 %v2529_v61, %v2526_v1  ;;  %v2531_v2 = vadd.f32 %v2529_v61, %v2528_v48 }
 0x56d   :  { %v2541_v13 = vsel %vm672_vm10, %v2539_v62, 0.0 }
 0x56e   :  { %v2533_v6 = vadd.f32 %v2532_v4, %v2531_v2  ;;  %v2540_v9 = vadd.f32 %v2538_v37, %v2537_v31  ;;  %v2523_v11 = vpop.f32.mrf.mxu3 }
 0x56f   :  { %v2510_v8 = vpop.f32.mrf.mxu2 }
 0x570   :  { %2534 = vadd.xlane.f32.xlu0 %v2533_v6  ;;  %v2542_v19 = vadd.f32 %v2541_v13, %v2540_v9 }
 0x572   :  { %2543 = vadd.xlane.f32.xlu2 %v2542_v19 }
 0x5e3   :  { %v2535_v17 = vpop.xlane.xlu0 %2534 }
 0x5e4   :  { %v2536_v26 = vadd.f32 %v2535_v17, %v1927_v16 }
 0x5e5   :  { %v2544_v30 = vpop.xlane.xlu2 %2543 }
 0x5e6   :  { %v2546_v18 = vmul.f32 0.001953125, %v2536_v26  ;;  %v2545_v20 = vadd.f32 %v2544_v30, %v1936_v15 }
 0x5e8   :  { %v2548_v22 = vmul.f32 %v2546_v18, %v2546_v18  ;;  %v2547_v21 = vmul.f32 0.001953125, %v2545_v20 }
 0x5ea   :  { %v2549_v14 = vsub.f32 %v2547_v21, %v2548_v22 }
 0x5ec   :  { %v2550_v24 = vadd.f32 1e-05, %v2549_v14 }
 0x5ee   :  { %2755 = vrsqrt.f32 %v2550_v24  ;;  %vm2557_vm3 = vweird.f32 %v2550_v24 }
 0x5f4   :  { %v2756_v27 = vpop.eup %2755 }
 0x5f5   :  { %v2552_v63 = vmul.f32 %v2756_v27, %v2550_v24  ;;  %vm2558_vm2 = vweird.f32 %v2756_v27 }
 0x5f6   :  { %vm2559_vm4 = vmor %vm2557_vm3, %vm2558_vm2 }
 0x5f7   :  { %v2553_v3 = vmul.f32 %v2756_v27, %v2552_v63 }
 0x5f9   :  { %v2554_v28 = vmul.f32 0.5, %v2553_v3 }
 0x5fb   :  { %v2555_v35 = vsub.f32 1.5, %v2554_v28 }
 0x5fd   :  { %v2556_v39 = vmul.f32 %v2756_v27, %v2555_v35 }
 0x5ff   :  { %v2560_v40 = vsel %vm2559_vm4, %v2756_v27, %v2556_v39 }
 0x600   :  { %v2562_v41 = vmul.f32 %v2561_v25, %v2560_v40 }
 0x602   :  { %2568 = vperm.xlu0 %2751, %v2562_v41   ;;  %v2564_v45 = vmul.f32 %v2562_v41, %v2546_v18 }
 0x604   :  { %v2565_v7 = vsub.f32 %v2563_v43, %v2564_v45 }
 0x606   :  { %2576 = vperm.xlu1 %2752, %v2565_v7  }
 0x674   :  { %v2569_v46 = vpop.permute.xlu0 %2568 }
 0x675   :  { %v2571_v49 = vmul.f32 %v2569_v46, %v3524_v36  ;;  %v2572_v50 = vmul.f32 %v2569_v46, %v3526_v54  ;;  %v2573_v51 = vmul.f32 %v2569_v46, %v3532_v23  ;;  %v2588_v52 = vmul.f32 %v2569_v46, %v2525_v10 }
 0x676   :  { %v2589_v55 = vmul.f32 %v2569_v46, %v2526_v1  ;;  %v2590_v56 = vmul.f32 %v2569_v46, %v2527_v60 }
 0x678   :  { %v2577_v44 = vpop.permute.xlu1 %2576 }
 0x679   :  { %v2579_v47 = vadd.f32 %v2577_v44, %v2571_v49  ;;  %v2580_v57 = vadd.f32 %v2577_v44, %v2572_v50  ;;  %v2581_v58 = vadd.f32 %v2577_v44, %v2573_v51  ;;  %v2591_v34 = vadd.f32 %v2588_v52, %v2577_v44 }
 0x67a   :  { %v2592_v5 = vadd.f32 %v2589_v55, %v2577_v44  ;;  %v2593_v12 = vadd.f32 %v2590_v56, %v2577_v44 }
 0x67b   :  { %v2582_v29 = vmax.f32 %v2579_v47, 0.0  ;;  %v2583_v59 = vmax.f32 %v2580_v57, 0.0  ;;  %v2584_v33 = vmax.f32 %v2581_v58, 0.0  ;;  %v2594_v32 = vmax.f32 %v2591_v34, 0.0 }
 0x67c   :  { %v2595_v36 = vmax.f32 %v2592_v5, 0.0  ;;  %v2596_v54 = vmax.f32 %v2593_v12, 0.0 }
 0x67d   :  { %2585 = vst [vmem:[%s3608_s8] sm:$0xff] %v2582_v29 }
 0x67e   :  { %2586 = vst [vmem:[%s3608_s8 + $0x8] sm:$0xff] %v2583_v59 }
 0x67f   :  { %2587 = vst.msk [vmem:[%s3608_s8 + $0x10] sm:$0xff] %vm672_vm10, %v2584_v33 }
 0x680   :  { %2738 = vst [vmem:[%s3608_s8 + $0x18] sm:$0xff] %v2594_v32 }
 0x681   :  { %2739 = vst [vmem:[%s3608_s8 + $0x20] sm:$0xff] %v2595_v36 }
 0x682   :  { %2740 = vst.msk [vmem:[%s3608_s8 + $0x28] sm:$0xff] %vm672_vm10, %v2596_v54 }

</bundles_post_ra>
